<compile_context>
chip_gen: v7x
topology: tpu7x:2x2x1
jax: 0.10.0
libtpu: 0.0.40
codegen_flags: <defaults>
</compile_context>

<pallas_src>
import jax
import jax.numpy as jnp
from jax import lax
from jax.experimental import pallas as pl
from jax.experimental.pallas import tpu as pltpu


def _pick_nb(N, C, HW_pad, itemsize=4, target_bytes=2 << 20, max_nb=8):
    """Samples per grid step: amortize per-step overhead, keep VMEM modest,
    keep the grid length >= 2 so both v7x TensorCores get work."""
    per_sample = C * HW_pad * itemsize
    nb = max(1, min(max_nb, target_bytes // per_sample))
    if N >= 2:
        nb = min(nb, max(1, N // 2))
    return int(max(1, min(nb, N)))


def _make_scconv_kernel(C, H, W, HW_pad, NB, group_num, K_per, compute_dtype):
    HW = H * W
    C2 = C // 2                  # up_channel == low_channel (alpha = 1/2)
    C4 = C2 // 2                 # squeezed channels (squeeze_radio = 2)
    inv_cnt = 1.0 / float((C // group_num) * HW)
    inv_hw = 1.0 / float(HW)
    eps = 1e-5                   # torch.nn.GroupNorm default
    cdt = compute_dtype
    taps = [(ky - 1, kx - 1) for ky in range(3) for kx in range(3)]
    BIAS_OFF = 10 * K_per        # bias row (lane_valid) in the im2col slab

    def kernel(x_ref, amat_ref, gamma_ref, beta_ref, wgamma_ref, masks_ref,
               wsq_ref, wbig_ref, pwc2e_ref, out_ref, slab_ref):
        # Zero the im2col slab once per grid step: the sublane-pad rows are
        # multiplied by zero weight columns, but stale VMEM could be NaN.
        # (Per-step, not program_id==0, so it is correct when the batch grid
        # is sharded across v7x's two TensorCores.)  Then deposit the
        # constant bias row = lane_valid (masks row 9).
        slab_ref[...] = jnp.zeros_like(slab_ref)
        slab_ref[pl.ds(BIAS_OFF, 1), :] = masks_ref[pl.ds(9, 1), :].astype(cdt)

        # Static per-sample loop (NB <= 8); all indices static.
        for nb in range(NB):
            x = x_ref[nb]                                    # (C, HW_pad) f32

            # ---------------- SRU: GroupNorm (folded to scale/shift) --------
            # Reduce over lanes first, then ONE tiny same-group matmul on the
            # stacked (C, 2) stats.
            rsum = jnp.sum(x, axis=1, keepdims=True)                    # (C,1)
            rsq = jnp.sum(x * x, axis=1, keepdims=True)                 # (C,1)
            stats = jnp.concatenate([rsum, rsq], axis=1)                # (C,2)
            g = jnp.dot(amat_ref[...], stats,
                        preferred_element_type=jnp.float32)             # (C,2)
            mean = g[:, 0:1] * inv_cnt
            var = jnp.maximum(g[:, 1:2] * inv_cnt - mean * mean, 0.0)
            inv = lax.rsqrt(var + eps)
            scale = inv * gamma_ref[...]                                # (C,1)
            shift_b = beta_ref[...] - mean * scale                      # (C,1)
            gn = x * scale + shift_b                                    # (C,HW)

            # ---------------- SRU: gating + reconstruct ---------------------
            z = gn * wgamma_ref[...]
            hard = z > 0.0               # == sigmoid(z) > 0.5, EUP-independent
            rew = jax.nn.sigmoid(z)
            w1 = jnp.where(hard, 1.0, rew)
            w2 = jnp.where(hard, 0.0, rew)
            # cat([x1[:C2]+x2[C2:], x1[C2:]+x2[:C2]]) == x1 + roll(x2, C2)
            y_full = w1 * x + pltpu.roll(w2 * x, shift=C2, axis=0)      # (C,HW)

            # ---------------- CRU: fused squeeze (blockdiag 1x1) ------------
            # wsq = blockdiag(sq1, sq2) -> up_lo = [up_s; low_s]  (C2, HW_pad)
            up_lo = jnp.dot(wsq_ref[...], y_full.astype(cdt),
                            preferred_element_type=jnp.float32)
            up_s = up_lo[:C4, :]                                 # (C4, HW_pad)

            # ---- CRU: GWC 3x3 + PWC1 + bias as ONE wide-K matmul -----------
            # 9 taps via lane rolls, masked with host-precomputed boundary
            # masks, written into the aligned VMEM slab; the bias row is the
            # constant lane_valid row already resident in the slab.
            for t, (dy, dx) in enumerate(taps):
                shift = (-(dy * W + dx)) % HW_pad
                rolled = pltpu.roll(up_s, shift=shift, axis=1) if shift else up_s
                piece = rolled * masks_ref[pl.ds(t, 1), :]
                slab_ref[pl.ds(t * K_per, C4), :] = piece.astype(cdt)
            slab_ref[pl.ds(9 * K_per, C4), :] = up_s.astype(cdt)  # PWC1 term

            y1 = jnp.dot(wbig_ref[...], slab_ref[...],
                         preferred_element_type=jnp.float32)     # (C, HW_pad)

            # ---- CRU: Y2 = cat([PWC2(low_s), low_s]) as one matmul ----------
            # pwc2e = [0 | [pwc2; I]] consumes the stacked [up_s; low_s].
            y2 = jnp.dot(pwc2e_ref[...], up_lo.astype(cdt),
                         preferred_element_type=jnp.float32)     # (C, HW_pad)

            # ---- softmax over global-avg-pooled cat([Y1, Y2]) channels ------
            a1 = jnp.sum(y1, axis=1, keepdims=True) * inv_hw            # (C,1)
            a2 = jnp.sum(y2, axis=1, keepdims=True) * inv_hw            # (C,1)
            m_all = jnp.maximum(jnp.max(a1, axis=0, keepdims=True),
                                jnp.max(a2, axis=0, keepdims=True))     # (1,1)
            e1 = jnp.exp(a1 - m_all)
            e2 = jnp.exp(a2 - m_all)
            zsum = (jnp.sum(e1, axis=0, keepdims=True)
                    + jnp.sum(e2, axis=0, keepdims=True))               # (1,1)
            invz = 1.0 / zsum                     # exact (removes approx bias)
            s1 = e1 * invz
            s2 = e2 * invz

            # out1 + out2 of the 2C-channel tensor -> single lane-dense store.
            out_ref[nb] = s1 * y1 + s2 * y2

    return kernel


def scconv_pallas(x, params, group_num=4, group_size=2,
                  compute_dtype=jnp.float32):
    N, C, H, W = x.shape
    assert C % 4 == 0 and C % group_num == 0
    HW = H * W
    HW_pad = max(128, ((HW + 127) // 128) * 128)     # lane-dense stores
    C2 = C // 2
    C4 = C2 // 2
    assert C4 % group_size == 0

    f32 = jnp.float32
    itemsize = jnp.dtype(compute_dtype).itemsize
    sub_align = 8 if itemsize == 4 else 16           # sublane tile (f32 / bf16)
    K_per = ((C4 + sub_align - 1) // sub_align) * sub_align
    K_total = 10 * K_per + sub_align                 # 9 GWC taps + PWC1 + bias

    # ---- GroupNorm constants folded on the host ----
    gamma = params["gn_gamma"].reshape(C, 1).astype(f32)
    beta = params["gn_beta"].reshape(C, 1).astype(f32)
    wgamma = gamma / jnp.sum(gamma)                                  # (C,1)

    cidx = jnp.arange(C)
    amat = (cidx[:, None] // (C // group_num)
            == cidx[None, :] // (C // group_num)).astype(f32)        # (C,C)

    # ---- fused squeeze: blockdiag(sq1, sq2) so [up_s; low_s] = wsq @ y ----
    sq1 = params["sq1_w"].reshape(C4, C2).astype(f32)
    sq2 = params["sq2_w"].reshape(C4, C2).astype(f32)
    zer = jnp.zeros((C4, C2), f32)
    wsq = jnp.concatenate([jnp.concatenate([sq1, zer], axis=1),
                           jnp.concatenate([zer, sq2], axis=1)],
                          axis=0).astype(compute_dtype)               # (C2,C)

    # ---- GWC (grouped 3x3) + PWC1 + bias -> one wide-K weight --------------
    gwc_w = params["gwc_w"].astype(f32)              # (C, C4/group_size, 3, 3)
    cout_pg = C // group_size
    cin_pg = C4 // group_size
    dense = jnp.zeros((C, C4, 3, 3), f32)
    for g in range(group_size):
        dense = dense.at[g * cout_pg:(g + 1) * cout_pg,
                         g * cin_pg:(g + 1) * cin_pg].set(
                             gwc_w[g * cout_pg:(g + 1) * cout_pg])
    pwc1 = params["pwc1_w"].reshape(C, C4).astype(f32)
    gwc_b = params["gwc_b"].reshape(C).astype(f32)
    taps = [(ky - 1, kx - 1) for ky in range(3) for kx in range(3)]
    wbig = jnp.zeros((C, K_total), f32)
    for t, (dy, dx) in enumerate(taps):
        wbig = wbig.at[:, t * K_per: t * K_per + C4].set(dense[:, :, dy + 1, dx + 1])
    wbig = wbig.at[:, 9 * K_per: 9 * K_per + C4].set(pwc1)     # PWC1 block
    wbig = wbig.at[:, 10 * K_per].set(gwc_b)                    # bias column
    wbig = wbig.astype(compute_dtype)                           # (C, K_total)

    # ---- PWC2 fused with identity, zero-padded to consume [up_s; low_s] ----
    pwc2 = params["pwc2_w"].reshape(C - C4, C4).astype(f32)
    pwc2_full = jnp.concatenate([pwc2, jnp.eye(C4, dtype=f32)], axis=0)  # (C,C4)
    pwc2_ext = jnp.concatenate([jnp.zeros((C, C4), f32), pwc2_full],
                               axis=1).astype(compute_dtype)             # (C,C2)

    # ---- host-precomputed 3x3 boundary masks + pad-lane validity -----------
    pos = jnp.arange(HW_pad)
    yy = pos // W
    xx = pos % W
    rows = []
    for dy, dx in taps:
        rows.append((yy + dy >= 0) & (yy + dy < H) &
                    (xx + dx >= 0) & (xx + dx < W) & (pos < HW))
    rows.append(pos < HW)                                   # lane_valid (bias)
    masks = jnp.stack(rows, axis=0).astype(f32)             # (10, HW_pad)

    # ---- input layout: (N_pad, C, HW_pad) f32, NB samples per grid step ----
    NB = _pick_nb(N, C, HW_pad)
    G = -(-N // NB)
    N_pad = G * NB
    x_flat = x.reshape(N, C, HW).astype(f32)
    if HW_pad != HW:
        x_flat = jnp.pad(x_flat, ((0, 0), (0, 0), (0, HW_pad - HW)))
    if N_pad != N:
        x_flat = jnp.pad(x_flat, ((0, N_pad - N), (0, 0), (0, 0)))

    kernel = _make_scconv_kernel(C, H, W, HW_pad, NB, group_num, K_per,
                                 compute_dtype)

    def whole(a):
        nd = a.ndim
        return pl.BlockSpec(a.shape, lambda n, nd=nd: (0,) * nd)

    weights = (amat, gamma, beta, wgamma, masks, wsq, wbig, pwc2_ext)
    in_specs = ([pl.BlockSpec((NB, C, HW_pad), lambda n: (n, 0, 0))]
                + [whole(a) for a in weights])
    out_specs = pl.BlockSpec((NB, C, HW_pad), lambda n: (n, 0, 0))

    # VMEM footprint: 2 bufs x (in + out) x NB*C*HW_pad*4B + small resident
    # weights + the (K_total, HW_pad) slab — a few MiB at most, safe on
    # v5e/v6e (128 MiB) and v7x (64 MiB) with the default scoped-VMEM limit.
    out_flat = pl.pallas_call(
        kernel,
        out_shape=jax.ShapeDtypeStruct((N_pad, C, HW_pad), f32),
        grid=(G,),
        in_specs=in_specs,
        out_specs=out_specs,
        scratch_shapes=[pltpu.VMEM((K_total, HW_pad), compute_dtype)],
        compiler_params=pltpu.CompilerParams(
            dimension_semantics=("parallel",)),     # v7x: shard batch over 2 TCs
    )(x_flat, *weights)

    out_flat = out_flat[:N, :, :HW]
    return out_flat.reshape(N, C, H, W)


def scconv_ref(x, params, group_num=4):
    """Pure-JAX reference mirroring the PyTorch forward (for validation)."""
    N, C, H, W = x.shape
    gamma = params["gn_gamma"]
    beta = params["gn_beta"]
    xg = x.reshape(N, group_num, -1)
    mean = xg.mean(axis=2, keepdims=True)
    var = xg.var(axis=2, keepdims=True)
    xn = ((xg - mean) / jnp.sqrt(var + 1e-5)).reshape(N, C, H, W)
    gn_x = xn * gamma[None, :, None, None] + beta[None, :, None, None]
    w_g = (gamma / jnp.sum(gamma))[None, :, None, None]
    rew = jax.nn.sigmoid(gn_x * w_g)
    w1 = jnp.where(rew > 0.5, jnp.ones_like(rew), rew)
    w2 = jnp.where(rew > 0.5, jnp.zeros_like(rew), rew)
    x1, x2 = w1 * x, w2 * x
    C2 = C // 2
    y = jnp.concatenate([x1[:, :C2] + x2[:, C2:], x1[:, C2:] + x2[:, :C2]], axis=1)
    up, low = y[:, :C2], y[:, C2:]

    def conv1x1(v, w):
        return jnp.einsum("oi,nihw->nohw", w, v)

    C4 = C2 // 2
    up_s = conv1x1(up, params["sq1_w"].reshape(C4, C2))
    low_s = conv1x1(low, params["sq2_w"].reshape(C4, C2))
    gwc = lax.conv_general_dilated(
        up_s, params["gwc_w"], (1, 1), ((1, 1), (1, 1)),
        dimension_numbers=("NCHW", "OIHW", "NCHW"),
        feature_group_count=2) + params["gwc_b"][None, :, None, None]
    y1 = gwc + conv1x1(up_s, params["pwc1_w"].reshape(C, C4))
    y2 = jnp.concatenate(
        [conv1x1(low_s, params["pwc2_w"].reshape(C - C4, C4)), low_s], axis=1)
    out = jnp.concatenate([y1, y2], axis=1)
    pooled = out.mean(axis=(2, 3), keepdims=True)
    out = jax.nn.softmax(pooled, axis=1) * out
    return out[:, :C] + out[:, C:]


if __name__ == "__main__":
    N, C, H, W = 2, 16, 16, 16        # op_channel=16, group_num=4 (ScConv defaults)
    C2, C4 = C // 2, C // 4

    key = jax.random.PRNGKey(0)
    ks = jax.random.split(key, 9)
    params = {
        "gn_gamma": 1.0 + 0.1 * jax.random.normal(ks[0], (C,), jnp.float32),
        "gn_beta": 0.1 * jax.random.normal(ks[1], (C,), jnp.float32),
        "sq1_w": 0.3 * jax.random.normal(ks[2], (C4, C2, 1, 1), jnp.float32),
        "sq2_w": 0.3 * jax.random.normal(ks[3], (C4, C2, 1, 1), jnp.float32),
        "gwc_w": 0.2 * jax.random.normal(ks[4], (C, C4 // 2, 3, 3), jnp.float32),
        "gwc_b": 0.05 * jax.random.normal(ks[5], (C,), jnp.float32),
        "pwc1_w": 0.3 * jax.random.normal(ks[6], (C, C4, 1, 1), jnp.float32),
        "pwc2_w": 0.3 * jax.random.normal(ks[7], (C - C4, C4, 1, 1), jnp.float32),
    }
    x = jax.random.normal(ks[8], (N, C, H, W), jnp.float32)

    out = scconv_pallas(x, params)          # f32 compute path for validation
    out = jax.block_until_ready(out)

    ref = scconv_ref(x, params)
    err = jnp.abs(out - ref)
    tol = 1e-3 + 1e-2 * jnp.abs(ref)
    # Fraction-based check: tolerant to rare gate-threshold flips from float
    # rounding (localized), but catches any systematic kernel bug.
    frac_bad = float(jnp.mean((err > tol).astype(jnp.float32)))
    med_err = float(jnp.median(err))
    if out.shape != (N, C, H, W) or frac_bad > 0.05 or med_err > 1e-3:
        raise AssertionError(
            f"mismatch vs reference: frac_bad={frac_bad:.4f} median_err={med_err:.2e}")

    print("KERNEL_OK")
</pallas_src>

<mosaic_0001>
module attributes {stable_mosaic.version = 11 : i64} {
  func.func @kernel(%arg0: i32, %arg1: memref<1x16x256xf32, #tpu.memory_space<vmem>>, %arg2: memref<16x16xf32, #tpu.memory_space<vmem>>, %arg3: memref<16x1xf32, #tpu.memory_space<vmem>>, %arg4: memref<16x1xf32, #tpu.memory_space<vmem>>, %arg5: memref<16x1xf32, #tpu.memory_space<vmem>>, %arg6: memref<10x256xf32, #tpu.memory_space<vmem>>, %arg7: memref<8x16xf32, #tpu.memory_space<vmem>>, %arg8: memref<16x88xf32, #tpu.memory_space<vmem>>, %arg9: memref<16x8xf32, #tpu.memory_space<vmem>>, %arg10: memref<1x16x256xf32, #tpu.memory_space<vmem>>, %arg11: memref<88x256xf32, #tpu.memory_space<vmem>>) attributes {dimension_semantics = [#tpu.dimension_semantics<parallel>], iteration_bounds = array<i64: 2>, scalar_prefetch = 0 : i64, scratch_operands = 1 : i64, tpu.core_type = #tpu.core_type<tc>, window_params = [{transform_indices = @transform_0, window_bounds = array<i64: 1, 16, 256>}, {pipeline_mode = #tpu.pipeline_mode<synchronous>, transform_indices = @transform_1, window_bounds = array<i64: 16, 16>}, {pipeline_mode = #tpu.pipeline_mode<synchronous>, transform_indices = @transform_2, window_bounds = array<i64: 16, 1>}, {pipeline_mode = #tpu.pipeline_mode<synchronous>, transform_indices = @transform_3, window_bounds = array<i64: 16, 1>}, {pipeline_mode = #tpu.pipeline_mode<synchronous>, transform_indices = @transform_4, window_bounds = array<i64: 16, 1>}, {pipeline_mode = #tpu.pipeline_mode<synchronous>, transform_indices = @transform_5, window_bounds = array<i64: 10, 256>}, {pipeline_mode = #tpu.pipeline_mode<synchronous>, transform_indices = @transform_6, window_bounds = array<i64: 8, 16>}, {pipeline_mode = #tpu.pipeline_mode<synchronous>, transform_indices = @transform_7, window_bounds = array<i64: 16, 88>}, {pipeline_mode = #tpu.pipeline_mode<synchronous>, transform_indices = @transform_8, window_bounds = array<i64: 16, 8>}, {transform_indices = @transform_9, window_bounds = array<i64: 1, 16, 256>}]} {
    %cst = arith.constant 0.000000e+00 : f32
    %0 = vector.broadcast %cst : f32 to vector<88x256xf32>
    %c0 = arith.constant 0 : index
    %c0_0 = arith.constant 0 : index
    %1 = vector.load %arg11[%c0, %c0_0] : memref<88x256xf32, #tpu.memory_space<vmem>>, vector<88x256xf32>
    tpu.vector_store %arg11[%c0, %c0_0], %0 {strides = array<i32>} : memref<88x256xf32, #tpu.memory_space<vmem>>, vector<88x256xf32>,
    %c9 = arith.constant 9 : index
    %c0_1 = arith.constant 0 : index
    %2 = vector.load %arg6[%c9, %c0_1] : memref<10x256xf32, #tpu.memory_space<vmem>>, vector<1x256xf32>
    %c80 = arith.constant 80 : index
    %c0_2 = arith.constant 0 : index
    %3 = vector.load %arg11[%c80, %c0_2] : memref<88x256xf32, #tpu.memory_space<vmem>>, vector<1x256xf32>
    tpu.vector_store %arg11[%c80, %c0_2], %2 {strides = array<i32>} : memref<88x256xf32, #tpu.memory_space<vmem>>, vector<1x256xf32>,
    %c0_3 = arith.constant 0 : index
    %c0_4 = arith.constant 0 : index
    %c0_5 = arith.constant 0 : index
    %4 = vector.load %arg1[%c0_3, %c0_4, %c0_5] : memref<1x16x256xf32, #tpu.memory_space<vmem>>, vector<1x16x256xf32>
    %5 = vector.shape_cast %4 : vector<1x16x256xf32> to vector<16x256xf32>
    %cst_6 = arith.constant dense<0.000000e+00> : vector<16xf32>
    %6 = vector.multi_reduction <add>, %5, %cst_6 [1] : vector<16x256xf32> to vector<16xf32>
    %7 = vector.shape_cast %6 : vector<16xf32> to vector<16x1xf32>
    %8 = arith.mulf %5, %5 : vector<16x256xf32>
    %cst_7 = arith.constant dense<0.000000e+00> : vector<16xf32>
    %9 = vector.multi_reduction <add>, %8, %cst_7 [1] : vector<16x256xf32> to vector<16xf32>
    %10 = vector.shape_cast %9 : vector<16xf32> to vector<16x1xf32>
    %11 = tpu.concatenate %7, %10 in 1 : vector<16x1xf32>, vector<16x1xf32> -> vector<16x2xf32>
    %c0_8 = arith.constant 0 : index
    %c0_9 = arith.constant 0 : index
    %12 = vector.load %arg2[%c0_8, %c0_9] : memref<16x16xf32, #tpu.memory_space<vmem>>, vector<16x16xf32>
    %cst_10 = arith.constant dense<0.000000e+00> : vector<16x2xf32>
    %13 = tpu.matmul %12, %11, %cst_10 {dimension_numbers = #tpu.dot_dimension_numbers<[1], [0], [0], [1], [0, 0, 1, 1], [], []>} : vector<16x16xf32>, vector<16x2xf32>, vector<16x2xf32> -> vector<16x2xf32>
    %14 = vector.extract_strided_slice %13 {offsets = [0, 0], sizes = [16, 1], strides = [1, 1]} : vector<16x2xf32> to vector<16x1xf32>
    %cst_11 = arith.constant 9.765625E-4 : f32
    %15 = vector.broadcast %cst_11 : f32 to vector<16x1xf32>
    %16 = arith.mulf %14, %15 : vector<16x1xf32>
    %17 = vector.extract_strided_slice %13 {offsets = [0, 1], sizes = [16, 1], strides = [1, 1]} : vector<16x2xf32> to vector<16x1xf32>
    %cst_12 = arith.constant 9.765625E-4 : f32
    %18 = vector.broadcast %cst_12 : f32 to vector<16x1xf32>
    %19 = arith.mulf %17, %18 : vector<16x1xf32>
    %20 = arith.mulf %16, %16 : vector<16x1xf32>
    %21 = arith.subf %19, %20 : vector<16x1xf32>
    %cst_13 = arith.constant 0.000000e+00 : f32
    %22 = vector.broadcast %cst_13 : f32 to vector<16x1xf32>
    %23 = arith.maximumf %21, %22 : vector<16x1xf32>
    %cst_14 = arith.constant 9.99999974E-6 : f32
    %24 = vector.broadcast %cst_14 : f32 to vector<16x1xf32>
    %25 = arith.addf %23, %24 : vector<16x1xf32>
    %26 = math.rsqrt %25 : vector<16x1xf32>
    %c0_15 = arith.constant 0 : index
    %c0_16 = arith.constant 0 : index
    %27 = vector.load %arg3[%c0_15, %c0_16] : memref<16x1xf32, #tpu.memory_space<vmem>>, vector<16x1xf32>
    %28 = arith.mulf %26, %27 : vector<16x1xf32>
    %c0_17 = arith.constant 0 : index
    %c0_18 = arith.constant 0 : index
    %29 = vector.load %arg4[%c0_17, %c0_18] : memref<16x1xf32, #tpu.memory_space<vmem>>, vector<16x1xf32>
    %30 = arith.mulf %16, %28 : vector<16x1xf32>
    %31 = arith.subf %29, %30 : vector<16x1xf32>
    %32 = vector.broadcast %28 : vector<16x1xf32> to vector<16x256xf32>
    %33 = arith.mulf %5, %32 : vector<16x256xf32>
    %34 = vector.broadcast %31 : vector<16x1xf32> to vector<16x256xf32>
    %35 = arith.addf %33, %34 : vector<16x256xf32>
    %c0_19 = arith.constant 0 : index
    %c0_20 = arith.constant 0 : index
    %36 = vector.load %arg5[%c0_19, %c0_20] : memref<16x1xf32, #tpu.memory_space<vmem>>, vector<16x1xf32>
    %37 = vector.broadcast %36 : vector<16x1xf32> to vector<16x256xf32>
    %38 = arith.mulf %35, %37 : vector<16x256xf32>
    %cst_21 = arith.constant 0.000000e+00 : f32
    %39 = vector.broadcast %cst_21 : f32 to vector<16x256xf32>
    %40 = arith.cmpf ogt, %38, %39 : vector<16x256xf32>
    %41 = arith.negf %38 : vector<16x256xf32>
    %42 = math.exp %41 : vector<16x256xf32>
    %cst_22 = arith.constant 1.000000e+00 : f32
    %43 = vector.broadcast %cst_22 : f32 to vector<16x256xf32>
    %44 = arith.addf %43, %42 : vector<16x256xf32>
    %45 = arith.divf %43, %44 : vector<16x256xf32>
    %cst_23 = arith.constant 1.000000e+00 : f32
    %46 = vector.broadcast %cst_23 : f32 to vector<16x256xf32>
    %47 = arith.select %40, %46, %45 : vector<16x256xi1>, vector<16x256xf32>
    %cst_24 = arith.constant 0.000000e+00 : f32
    %48 = vector.broadcast %cst_24 : f32 to vector<16x256xf32>
    %49 = arith.select %40, %48, %45 : vector<16x256xi1>, vector<16x256xf32>
    %50 = arith.mulf %47, %5 : vector<16x256xf32>
    %51 = arith.mulf %49, %5 : vector<16x256xf32>
    %c8_i32 = arith.constant 8 : i32
    %52 = tpu.dynamic_rotate %51 by %c8_i32 dim 0 : vector<16x256xf32>, i32 -> vector<16x256xf32>
    %53 = arith.addf %50, %52 : vector<16x256xf32>
    %c0_25 = arith.constant 0 : index
    %c0_26 = arith.constant 0 : index
    %54 = vector.load %arg7[%c0_25, %c0_26] : memref<8x16xf32, #tpu.memory_space<vmem>>, vector<8x16xf32>
    %cst_27 = arith.constant dense<0.000000e+00> : vector<8x256xf32>
    %55 = tpu.matmul %54, %53, %cst_27 {dimension_numbers = #tpu.dot_dimension_numbers<[1], [0], [0], [1], [0, 0, 1, 1], [], []>} : vector<8x16xf32>, vector<16x256xf32>, vector<8x256xf32> -> vector<8x256xf32>
    %56 = vector.extract_strided_slice %55 {offsets = [0, 0], sizes = [4, 256], strides = [1, 1]} : vector<8x256xf32> to vector<4x256xf32>
    %c17_i32 = arith.constant 17 : i32
    %57 = tpu.dynamic_rotate %56 by %c17_i32 dim 1 : vector<4x256xf32>, i32 -> vector<4x256xf32>
    %c0_28 = arith.constant 0 : index
    %c0_29 = arith.constant 0 : index
    %58 = vector.load %arg6[%c0_28, %c0_29] : memref<10x256xf32, #tpu.memory_space<vmem>>, vector<1x256xf32>
    %59 = vector.broadcast %58 : vector<1x256xf32> to vector<4x256xf32>
    %60 = arith.mulf %57, %59 : vector<4x256xf32>
    %c0_30 = arith.constant 0 : index
    %c0_31 = arith.constant 0 : index
    %61 = vector.load %arg11[%c0_30, %c0_31] : memref<88x256xf32, #tpu.memory_space<vmem>>, vector<4x256xf32>
    tpu.vector_store %arg11[%c0_30, %c0_31], %60 {strides = array<i32>} : memref<88x256xf32, #tpu.memory_space<vmem>>, vector<4x256xf32>,
    %c16_i32 = arith.constant 16 : i32
    %62 = tpu.dynamic_rotate %56 by %c16_i32 dim 1 : vector<4x256xf32>, i32 -> vector<4x256xf32>
    %c1 = arith.constant 1 : index
    %c0_32 = arith.constant 0 : index
    %63 = vector.load %arg6[%c1, %c0_32] : memref<10x256xf32, #tpu.memory_space<vmem>>, vector<1x256xf32>
    %64 = vector.broadcast %63 : vector<1x256xf32> to vector<4x256xf32>
    %65 = arith.mulf %62, %64 : vector<4x256xf32>
    %c8 = arith.constant 8 : index
    %c0_33 = arith.constant 0 : index
    %66 = vector.load %arg11[%c8, %c0_33] : memref<88x256xf32, #tpu.memory_space<vmem>>, vector<4x256xf32>
    tpu.vector_store %arg11[%c8, %c0_33], %65 {strides = array<i32>} : memref<88x256xf32, #tpu.memory_space<vmem>>, vector<4x256xf32>,
    %c15_i32 = arith.constant 15 : i32
    %67 = tpu.dynamic_rotate %56 by %c15_i32 dim 1 : vector<4x256xf32>, i32 -> vector<4x256xf32>
    %c2 = arith.constant 2 : index
    %c0_34 = arith.constant 0 : index
    %68 = vector.load %arg6[%c2, %c0_34] : memref<10x256xf32, #tpu.memory_space<vmem>>, vector<1x256xf32>
    %69 = vector.broadcast %68 : vector<1x256xf32> to vector<4x256xf32>
    %70 = arith.mulf %67, %69 : vector<4x256xf32>
    %c16 = arith.constant 16 : index
    %c0_35 = arith.constant 0 : index
    %71 = vector.load %arg11[%c16, %c0_35] : memref<88x256xf32, #tpu.memory_space<vmem>>, vector<4x256xf32>
    tpu.vector_store %arg11[%c16, %c0_35], %70 {strides = array<i32>} : memref<88x256xf32, #tpu.memory_space<vmem>>, vector<4x256xf32>,
    %c1_i32 = arith.constant 1 : i32
    %72 = tpu.dynamic_rotate %56 by %c1_i32 dim 1 : vector<4x256xf32>, i32 -> vector<4x256xf32>
    %c3 = arith.constant 3 : index
    %c0_36 = arith.constant 0 : index
    %73 = vector.load %arg6[%c3, %c0_36] : memref<10x256xf32, #tpu.memory_space<vmem>>, vector<1x256xf32>
    %74 = vector.broadcast %73 : vector<1x256xf32> to vector<4x256xf32>
    %75 = arith.mulf %72, %74 : vector<4x256xf32>
    %c24 = arith.constant 24 : index
    %c0_37 = arith.constant 0 : index
    %76 = vector.load %arg11[%c24, %c0_37] : memref<88x256xf32, #tpu.memory_space<vmem>>, vector<4x256xf32>
    tpu.vector_store %arg11[%c24, %c0_37], %75 {strides = array<i32>} : memref<88x256xf32, #tpu.memory_space<vmem>>, vector<4x256xf32>,
    %c4 = arith.constant 4 : index
    %c0_38 = arith.constant 0 : index
    %77 = vector.load %arg6[%c4, %c0_38] : memref<10x256xf32, #tpu.memory_space<vmem>>, vector<1x256xf32>
    %78 = vector.broadcast %77 : vector<1x256xf32> to vector<4x256xf32>
    %79 = arith.mulf %56, %78 : vector<4x256xf32>
    %c32 = arith.constant 32 : index
    %c0_39 = arith.constant 0 : index
    %80 = vector.load %arg11[%c32, %c0_39] : memref<88x256xf32, #tpu.memory_space<vmem>>, vector<4x256xf32>
    tpu.vector_store %arg11[%c32, %c0_39], %79 {strides = array<i32>} : memref<88x256xf32, #tpu.memory_space<vmem>>, vector<4x256xf32>,
    %c255_i32 = arith.constant 255 : i32
    %81 = tpu.dynamic_rotate %56 by %c255_i32 dim 1 : vector<4x256xf32>, i32 -> vector<4x256xf32>
    %c5 = arith.constant 5 : index
    %c0_40 = arith.constant 0 : index
    %82 = vector.load %arg6[%c5, %c0_40] : memref<10x256xf32, #tpu.memory_space<vmem>>, vector<1x256xf32>
    %83 = vector.broadcast %82 : vector<1x256xf32> to vector<4x256xf32>
    %84 = arith.mulf %81, %83 : vector<4x256xf32>
    %c40 = arith.constant 40 : index
    %c0_41 = arith.constant 0 : index
    %85 = vector.load %arg11[%c40, %c0_41] : memref<88x256xf32, #tpu.memory_space<vmem>>, vector<4x256xf32>
    tpu.vector_store %arg11[%c40, %c0_41], %84 {strides = array<i32>} : memref<88x256xf32, #tpu.memory_space<vmem>>, vector<4x256xf32>,
    %c241_i32 = arith.constant 241 : i32
    %86 = tpu.dynamic_rotate %56 by %c241_i32 dim 1 : vector<4x256xf32>, i32 -> vector<4x256xf32>
    %c6 = arith.constant 6 : index
    %c0_42 = arith.constant 0 : index
    %87 = vector.load %arg6[%c6, %c0_42] : memref<10x256xf32, #tpu.memory_space<vmem>>, vector<1x256xf32>
    %88 = vector.broadcast %87 : vector<1x256xf32> to vector<4x256xf32>
    %89 = arith.mulf %86, %88 : vector<4x256xf32>
    %c48 = arith.constant 48 : index
    %c0_43 = arith.constant 0 : index
    %90 = vector.load %arg11[%c48, %c0_43] : memref<88x256xf32, #tpu.memory_space<vmem>>, vector<4x256xf32>
    tpu.vector_store %arg11[%c48, %c0_43], %89 {strides = array<i32>} : memref<88x256xf32, #tpu.memory_space<vmem>>, vector<4x256xf32>,
    %c240_i32 = arith.constant 240 : i32
    %91 = tpu.dynamic_rotate %56 by %c240_i32 dim 1 : vector<4x256xf32>, i32 -> vector<4x256xf32>
    %c7 = arith.constant 7 : index
    %c0_44 = arith.constant 0 : index
    %92 = vector.load %arg6[%c7, %c0_44] : memref<10x256xf32, #tpu.memory_space<vmem>>, vector<1x256xf32>
    %93 = vector.broadcast %92 : vector<1x256xf32> to vector<4x256xf32>
    %94 = arith.mulf %91, %93 : vector<4x256xf32>
    %c56 = arith.constant 56 : index
    %c0_45 = arith.constant 0 : index
    %95 = vector.load %arg11[%c56, %c0_45] : memref<88x256xf32, #tpu.memory_space<vmem>>, vector<4x256xf32>
    tpu.vector_store %arg11[%c56, %c0_45], %94 {strides = array<i32>} : memref<88x256xf32, #tpu.memory_space<vmem>>, vector<4x256xf32>,
    %c239_i32 = arith.constant 239 : i32
    %96 = tpu.dynamic_rotate %56 by %c239_i32 dim 1 : vector<4x256xf32>, i32 -> vector<4x256xf32>
    %c8_46 = arith.constant 8 : index
    %c0_47 = arith.constant 0 : index
    %97 = vector.load %arg6[%c8_46, %c0_47] : memref<10x256xf32, #tpu.memory_space<vmem>>, vector<1x256xf32>
    %98 = vector.broadcast %97 : vector<1x256xf32> to vector<4x256xf32>
    %99 = arith.mulf %96, %98 : vector<4x256xf32>
    %c64 = arith.constant 64 : index
    %c0_48 = arith.constant 0 : index
    %100 = vector.load %arg11[%c64, %c0_48] : memref<88x256xf32, #tpu.memory_space<vmem>>, vector<4x256xf32>
    tpu.vector_store %arg11[%c64, %c0_48], %99 {strides = array<i32>} : memref<88x256xf32, #tpu.memory_space<vmem>>, vector<4x256xf32>,
    %c72 = arith.constant 72 : index
    %c0_49 = arith.constant 0 : index
    %101 = vector.load %arg11[%c72, %c0_49] : memref<88x256xf32, #tpu.memory_space<vmem>>, vector<4x256xf32>
    tpu.vector_store %arg11[%c72, %c0_49], %56 {strides = array<i32>} : memref<88x256xf32, #tpu.memory_space<vmem>>, vector<4x256xf32>,
    %c0_50 = arith.constant 0 : index
    %c0_51 = arith.constant 0 : index
    %102 = vector.load %arg8[%c0_50, %c0_51] : memref<16x88xf32, #tpu.memory_space<vmem>>, vector<16x88xf32>
    %c0_52 = arith.constant 0 : index
    %c0_53 = arith.constant 0 : index
    %103 = vector.load %arg11[%c0_52, %c0_53] : memref<88x256xf32, #tpu.memory_space<vmem>>, vector<88x256xf32>
    %cst_54 = arith.constant dense<0.000000e+00> : vector<16x256xf32>
    %104 = tpu.matmul %102, %103, %cst_54 {dimension_numbers = #tpu.dot_dimension_numbers<[1], [0], [0], [1], [0, 0, 1, 1], [], []>} : vector<16x88xf32>, vector<88x256xf32>, vector<16x256xf32> -> vector<16x256xf32>
    %c0_55 = arith.constant 0 : index
    %c0_56 = arith.constant 0 : index
    %105 = vector.load %arg9[%c0_55, %c0_56] : memref<16x8xf32, #tpu.memory_space<vmem>>, vector<16x8xf32>
    %cst_57 = arith.constant dense<0.000000e+00> : vector<16x256xf32>
    %106 = tpu.matmul %105, %55, %cst_57 {dimension_numbers = #tpu.dot_dimension_numbers<[1], [0], [0], [1], [0, 0, 1, 1], [], []>} : vector<16x8xf32>, vector<8x256xf32>, vector<16x256xf32> -> vector<16x256xf32>
    %cst_58 = arith.constant dense<0.000000e+00> : vector<16xf32>
    %107 = vector.multi_reduction <add>, %104, %cst_58 [1] : vector<16x256xf32> to vector<16xf32>
    %108 = vector.shape_cast %107 : vector<16xf32> to vector<16x1xf32>
    %cst_59 = arith.constant 3.906250e-03 : f32
    %109 = vector.broadcast %cst_59 : f32 to vector<16x1xf32>
    %110 = arith.mulf %108, %109 : vector<16x1xf32>
    %cst_60 = arith.constant dense<0.000000e+00> : vector<16xf32>
    %111 = vector.multi_reduction <add>, %106, %cst_60 [1] : vector<16x256xf32> to vector<16xf32>
    %112 = vector.shape_cast %111 : vector<16xf32> to vector<16x1xf32>
    %cst_61 = arith.constant 3.906250e-03 : f32
    %113 = vector.broadcast %cst_61 : f32 to vector<16x1xf32>
    %114 = arith.mulf %112, %113 : vector<16x1xf32>
    %cst_62 = arith.constant dense<0xFF800000> : vector<1xf32>
    %115 = vector.multi_reduction <maximumf>, %110, %cst_62 [0] : vector<16x1xf32> to vector<1xf32>
    %116 = vector.shape_cast %115 : vector<1xf32> to vector<1x1xf32>
    %cst_63 = arith.constant dense<0xFF800000> : vector<1xf32>
    %117 = vector.multi_reduction <maximumf>, %114, %cst_63 [0] : vector<16x1xf32> to vector<1xf32>
    %118 = vector.shape_cast %117 : vector<1xf32> to vector<1x1xf32>
    %119 = arith.maximumf %116, %118 : vector<1x1xf32>
    %120 = vector.broadcast %119 : vector<1x1xf32> to vector<16x1xf32>
    %121 = arith.subf %110, %120 : vector<16x1xf32>
    %122 = math.exp %121 : vector<16x1xf32>
    %123 = vector.broadcast %119 : vector<1x1xf32> to vector<16x1xf32>
    %124 = arith.subf %114, %123 : vector<16x1xf32>
    %125 = math.exp %124 : vector<16x1xf32>
    %cst_64 = arith.constant dense<0.000000e+00> : vector<1xf32>
    %126 = vector.multi_reduction <add>, %122, %cst_64 [0] : vector<16x1xf32> to vector<1xf32>
    %127 = vector.shape_cast %126 : vector<1xf32> to vector<1x1xf32>
    %cst_65 = arith.constant dense<0.000000e+00> : vector<1xf32>
    %128 = vector.multi_reduction <add>, %125, %cst_65 [0] : vector<16x1xf32> to vector<1xf32>
    %129 = vector.shape_cast %128 : vector<1xf32> to vector<1x1xf32>
    %130 = arith.addf %127, %129 : vector<1x1xf32>
    %cst_66 = arith.constant 1.000000e+00 : f32
    %131 = vector.broadcast %cst_66 : f32 to vector<1x1xf32>
    %132 = arith.divf %131, %130 : vector<1x1xf32>
    %133 = vector.broadcast %132 : vector<1x1xf32> to vector<16x1xf32>
    %134 = arith.mulf %122, %133 : vector<16x1xf32>
    %135 = vector.broadcast %132 : vector<1x1xf32> to vector<16x1xf32>
    %136 = arith.mulf %125, %135 : vector<16x1xf32>
    %137 = vector.broadcast %134 : vector<16x1xf32> to vector<16x256xf32>
    %138 = arith.mulf %137, %104 : vector<16x256xf32>
    %139 = vector.broadcast %136 : vector<16x1xf32> to vector<16x256xf32>
    %140 = arith.mulf %139, %106 : vector<16x256xf32>
    %141 = arith.addf %138, %140 : vector<16x256xf32>
    %c0_67 = arith.constant 0 : index
    %c0_68 = arith.constant 0 : index
    %c0_69 = arith.constant 0 : index
    %142 = vector.load %arg10[%c0_67, %c0_68, %c0_69] : memref<1x16x256xf32, #tpu.memory_space<vmem>>, vector<1x16x256xf32>
    %143 = vector.shape_cast %142 : vector<1x16x256xf32> to vector<16x256xf32>
    %144 = vector.shape_cast %141 : vector<16x256xf32> to vector<1x16x256xf32>
    tpu.vector_store %arg10[%c0_67, %c0_68, %c0_69], %144 {strides = array<i32>} : memref<1x16x256xf32, #tpu.memory_space<vmem>>, vector<1x16x256xf32>,
    return
  }
  func.func @transform_0(%arg0: i32) -> (i32, i32, i32) {
    %c0_i32 = arith.constant 0 : i32
    %c0_i32_0 = arith.constant 0 : i32
    %c0_i32_1 = arith.constant 0 : i32
    return %arg0, %c0_i32, %c0_i32_0 : i32, i32, i32
  }
  func.func @transform_1(%arg0: i32) -> (i32, i32) {
    %c0_i32 = arith.constant 0 : i32
    %c0_i32_0 = arith.constant 0 : i32
    %c0_i32_1 = arith.constant 0 : i32
    return %c0_i32, %c0_i32_0 : i32, i32
  }
  func.func @transform_2(%arg0: i32) -> (i32, i32) {
    %c0_i32 = arith.constant 0 : i32
    %c0_i32_0 = arith.constant 0 : i32
    %c0_i32_1 = arith.constant 0 : i32
    return %c0_i32, %c0_i32_0 : i32, i32
  }
  func.func @transform_3(%arg0: i32) -> (i32, i32) {
    %c0_i32 = arith.constant 0 : i32
    %c0_i32_0 = arith.constant 0 : i32
    %c0_i32_1 = arith.constant 0 : i32
    return %c0_i32, %c0_i32_0 : i32, i32
  }
  func.func @transform_4(%arg0: i32) -> (i32, i32) {
    %c0_i32 = arith.constant 0 : i32
    %c0_i32_0 = arith.constant 0 : i32
    %c0_i32_1 = arith.constant 0 : i32
    return %c0_i32, %c0_i32_0 : i32, i32
  }
  func.func @transform_5(%arg0: i32) -> (i32, i32) {
    %c0_i32 = arith.constant 0 : i32
    %c0_i32_0 = arith.constant 0 : i32
    %c0_i32_1 = arith.constant 0 : i32
    return %c0_i32, %c0_i32_0 : i32, i32
  }
  func.func @transform_6(%arg0: i32) -> (i32, i32) {
    %c0_i32 = arith.constant 0 : i32
    %c0_i32_0 = arith.constant 0 : i32
    %c0_i32_1 = arith.constant 0 : i32
    return %c0_i32, %c0_i32_0 : i32, i32
  }
  func.func @transform_7(%arg0: i32) -> (i32, i32) {
    %c0_i32 = arith.constant 0 : i32
    %c0_i32_0 = arith.constant 0 : i32
    %c0_i32_1 = arith.constant 0 : i32
    return %c0_i32, %c0_i32_0 : i32, i32
  }
  func.func @transform_8(%arg0: i32) -> (i32, i32) {
    %c0_i32 = arith.constant 0 : i32
    %c0_i32_0 = arith.constant 0 : i32
    %c0_i32_1 = arith.constant 0 : i32
    return %c0_i32, %c0_i32_0 : i32, i32
  }
  func.func @transform_9(%arg0: i32) -> (i32, i32, i32) {
    %c0_i32 = arith.constant 0 : i32
    %c0_i32_0 = arith.constant 0 : i32
    %c0_i32_1 = arith.constant 0 : i32
    return %arg0, %c0_i32, %c0_i32_0 : i32, i32, i32
  }
}

</mosaic_0001>

<bundles_post_ra>
// kernel: tpu_custom_call.1
= control target key start
LH: loop header
LB: loop body
LE: loop exit
PB: predicated region body
PF: predicated region fallthrough
CT: control target
= control target key end

     0   :  { %14 = vsyncpa [#allocation4], 0  ;;  %s2028_s0 = inlined_call_operand.vmem [shape: f32[2,16,256], index: 0, kind: input, shape index: {}]   ;;  %s2029_s1 = inlined_call_operand.hbm [shape: f32[16,16], index: 1, kind: input, shape index: {}]   ;;  %s2030_s2 = inlined_call_operand.vmem [shape: f32[16,1], index: 2, kind: input, shape index: {}]   ;;  %s2031_s3 = inlined_call_operand.vmem [shape: f32[16,1], index: 3, kind: input, shape index: {}]   ;;  %s2032_s4 = inlined_call_operand.vmem [shape: f32[16,1], index: 4, kind: input, shape index: {}]   ;;  %s2033_s5 = inlined_call_operand.hbm [shape: f32[10,256], index: 5, kind: input, shape index: {}]   ;;  %s2034_s6 = inlined_call_operand.vmem [shape: f32[8,16], index: 6, kind: input, shape index: {}]   ;;  %s2035_s7 = inlined_call_operand.vmem [shape: f32[16,88], index: 7, kind: input, shape index: {}]   ;;  %s2036_s8 = inlined_call_operand.vmem [shape: f32[16,8], index: 8, kind: input, shape index: {}]   ;;  %s2037_s9 = inlined_call_operand.hbm [shape: f32[2,16,256], index: 9, kind: output, shape index: {}]  }
   0x1   :  { %15 = vsyncpa [#allocation7], 0 }
   0x2   :  { %16 = vsyncpa [#allocation5], 0 }
   0x3   :  { %18 = vsyncpa [#allocation5 + $0x1], 0  ;;  %s1669_s30 = smov 0   ;;  %s1671_s10 = smov 0  }
   0x4   :  { %s1673_s11 = smov 0   ;;  %s1675_s12 = smov 0  }
   0x5 LB: > { %2044 = sst [smem:[#allocation12_spill]] %s1594_s11  ;;  %s1690_s13 = sadd.s32 4294967295, %s1598_s12   ;;  %s1598_s12 = sphi %s1675_s12, %s2058_s12   ;;  %s1594_s11 = sphi %s1673_s11, %s2060_s11   ;;  %s1590_s10 = sphi %s1671_s10, %s2062_s10   ;;  %s1586_s30 = sphi %s1669_s30, %s2061_s30  }
   0x6   : > { %s1294_s14 = sadd.s32 4294967294, %s1598_s12   ;;  %s1694_s15 = sadd.s32 1, %s1598_s12  }
   0x7   : > { %2045 = sst [smem:[#allocation13_spill]] %s1694_s15  ;;  %s225_s16 = sadd.s32 1, %s1594_s11 }
   0x8   : > { %s222_s17 = ssub.s32 %s1598_s12, %s1694_s15  ;;  %p235_p0 = scmp.ne.s32.totalorder %s1594_s11, %s1590_s10 }
   0x9   : > { %p223_p1 = scmp.eq.s32.totalorder %s222_s17, 0  ;;  %p236_p2 = scmp.eq.s32.totalorder %s1690_s13, 1 }
   0xa   : > { %p241_p3 = scmp.ne.s32.totalorder %s1590_s10, %s1586_s30  ;;  %p242_p4 = scmp.eq.s32.totalorder %s1294_s14, 1 }
   0xb   : > { %s1705_s18 = scalar_select %p223_p1, %s1594_s11, %s225_s16  }
   0xc   : > { %p1707_p5 = por %p236_p2, %p235_p0  ;;  %p1711_p6 = por %p242_p4, %p241_p3 }
   0xd   : > { %2046 = sst [smem:[#allocation14_spill]] %s1705_s18  ;;  %p1295_p7 = scmp.ge.s32.totalorder %s1598_s12, 1 }
   0xe   : > { %s2047_s19 = scalar_select %p1707_p5, 1, 0 }
   0xf   : > { %s2048_s20 = scalar_select %p1711_p6, 1, 0 }
  0x10   : > { %p249_p8 = scmp.lt.s32.totalorder %s1598_s12, 3  ;;  %p2038_p9 = scmp.eq.s32.totalorder %s1690_s13, 0 }
  0x11   : > { %s1600_s22 = smov [#allocation3]   ;;  %s1601_s25 = smov [#allocation6]  }
  0x12   : > { %p1718_p10 = pnand %p1295_p7, %p249_p8  ;;  %s261_s23 = sshll.u32 %s1600_s22, 4  ;;  %s262_s23 = int_to_ptr.vmem [resolvable:$true] %s261_s23 }
  0x13   : > { %s283_s26 = sshll.u32 %s1601_s25, 4  ;;  %s1472_s29 = scalar_lea.hbm %s2029_s1, 256  ;;  %s1730_s26 = int_to_ptr.vmem [resolvable:$true] %s283_s26 }
  0x14   : > { %s2049_s21 = scalar_select %p1718_p10, 1, 0 }
  0x15   : > { %p1372_p11 = pneg %p1718_p10  ;;  %p1473_p13 = scmp.ne.s32.totalorder %s2029_s1, %s1472_s29 }
  0x16   : > { %p1479_p3 = scmp.lt.u32.totalorder %s1472_s29, %s2029_s1 }
  0x17   : > { %p1726_p12 = pnand %p2038_p9, %p1372_p11 }
  0x19   : > { %p1474_p0 = pneg %p1726_p12 }
  0x1b   : > { %p1475_p1 = pnand %p1474_p0, %p1473_p13 }
  0x1d   : > { %p1476_p2 = pneg %p1475_p1 }
  0x1f   : > { %p1481_p4 = pnand %p1479_p3, %p1476_p2 }
  0x21   : > { %1484 = shalt.err (!%p1481_p4)
}
  0x22   : > { %s1485_s25 = scalar_lea.vmem %s262_s23, 256  ;;  %p1493_p9 = scmp.lt.s32.totalorder %s262_s23, %s262_s23 }
  0x23   : > { %p1486_p7 = scmp.ne.s32.totalorder %s262_s23, %s1485_s25  ;;  %p1494_p6 = scmp.lt.s32.totalorder %s1485_s25, %s1485_s25 }
  0x25   : > { %p1488_p8 = pnand %p1486_p7, %p1474_p0  ;;  %p1495_p5 = por %p1494_p6, %p1493_p9 }
  0x27   : > { %p1489_p11 = pneg %p1488_p8 }
  0x29   : > { %p1496_p10 = pnand %p1495_p5, %p1489_p11 }
  0x2b   : > { %1499 = shalt.err (!%p1496_p10)
}
  0x2c   : > { %s1602_s27 = smov 128   ;;  %s1603_s28 = smov 8  }
  0x2d   : > { %1375 = dma.hbm_to_vmem [thread:$0]  (!%p1726_p12), %s2029_s1, 256, %s262_s23, [#allocation4], %s1602_s27, %s1602_s27, %s1603_s28  }
  0x2e   : > { %s1500_s22 = scalar_lea.hbm %s2033_s5, 512 }
  0x2f   : > { %p1501_p13 = scmp.ne.s32.totalorder %s2033_s5, %s1500_s22  ;;  %p1507_p9 = scmp.lt.u32.totalorder %s1500_s22, %s2033_s5 }
  0x31   : > { %p1503_p5 = pnand %p1501_p13, %p1474_p0 }
  0x33   : > { %p1504_p6 = pneg %p1503_p5 }
  0x35   : > { %p1509_p10 = pnand %p1507_p9, %p1504_p6 }
  0x37   : > { %1512 = shalt.err (!%p1509_p10)
}
  0x38   : > { %s1513_s23 = scalar_lea.vmem %s1730_s26, 512  ;;  %p1521_p4 = scmp.lt.s32.totalorder %s1730_s26, %s1730_s26 }
  0x39   : > { %p1514_p1 = scmp.ne.s32.totalorder %s1730_s26, %s1513_s23  ;;  %p1522_p7 = scmp.lt.s32.totalorder %s1513_s23, %s1513_s23 }
  0x3b   : > { %p1516_p2 = pnand %p1514_p1, %p1474_p0  ;;  %p1523_p8 = por %p1522_p7, %p1521_p4 }
  0x3d   : > { %p1517_p3 = pneg %p1516_p2 }
  0x3f   : > { %p1524_p11 = pnand %p1523_p8, %p1517_p3 }
  0x41   : > { %1527 = shalt.err (!%p1524_p11)
}
  0x42   : > { %s1604_s11 = smov 256   ;;  %s1605_s15 = smov 16  }
  0x43   : > { %1378 = dma.hbm_to_vmem [thread:$0]  (!%p1726_p12), %s2033_s5, 512, %s1730_s26, [#allocation7], %s1604_s11, %s1604_s11, %s1605_s15  }
  0x44   : > { %p2051_p13 = scmp.ne.s32.totalorder %s2049_s21, 0 }
  0x45   : > { %p2052_p0 = scmp.eq.s32.totalorder (!%p2051_p13), %s1690_s13, 0 }
  0x46   : > { %316 = sbr.rel (%p2051_p13) target bundleno = 1712 (0x6b0), region = 56 }
  0x4d   : > { %1573 = dma.done.wait (%p2052_p0), [#allocation4], 256   ;;  %p2053_p5 = pmov %p2052_p0 }
  0x4e   : > { %p2054_p6 = pmov %p2052_p0 }
  0x4f   : > { %1575 = vsyncadd (%p2053_p5), [#allocation4], 4294967040 }
  0x50   : > { %1577 = dma.done.wait (%p2054_p6), [#allocation7], 512   ;;  %p2055_p9 = pmov %p2052_p0 }
  0x51   : > { %p356_p10 = scmp.lt.s32.totalorder %s1690_s13, 1  ;;  %v415_v12 = vld [vmem:[#allocation3] sm:$0xff]  ;;  %vm417_vm0 = vcmask 130048   ;;  %vm412_vm1 = vcmask 7168   ;;  %v416_v20 = vld [vmem:[#allocation3 + $0x8] sm:$0xff]  ;;  %s1606_s14 = smov 1  }
  0x52   : > { %1579 = vsyncadd (%p2055_p9), [#allocation7], 4294966784  ;;  %1331 = vmatprep.mubr.msk.f32.mxu1 %vm417_vm0, %v415_v12  ;;  %v519_v27 = vld [vmem:[%s2030_s2] sm:$0xff]  ;;  %v520_v28 = vld [vmem:[%s2030_s2 + $0x8] sm:$0xff]  ;;  %v1607_v29 = vmov 1   ;;  %s1608_s23 = smov 127  }
  0x53   : > { %s357_s24 = scalar_select %p356_p10, %s1690_s13, 1  ;;  %1439 = vset.pattern.permute.xlu0 %v1607_v29  ;;  %1438 = vset.pattern.permute.xlu1 %v1607_v29  ;;  %v571_v44 = vld [vmem:[%s2032_s4] sm:$0xff]  ;;  %v1609_v45 = vmov 0   ;;  %v532_v46 = vld [vmem:[%s2031_s3 + $0x8] sm:$0xff]  ;;  %v1610_v55 = vmov 0.0   ;;  %vm1032_vm7 = vcmask 64512  }
  0x54   : > { %v531_v49 = vld [vmem:[%s2031_s3] sm:$0xff]  ;;  %v572_v54 = vld [vmem:[%s2032_s4 + $0x8] sm:$0xff]  ;;  %361 = vst [vmem:[#allocation2] sm:$0xff] %v1610_v55  ;;  %362 = vst [vmem:[#allocation2 + $0x8] sm:$0xff] %v1610_v55  ;;  %1017 = vmatprep.mubr.f32.mxu0 %v1610_v55  ;;  %s1611_s17 = smov 17   ;;  %s1612_s22 = smov 16  }
  0x55   : > { %s1321_s26 = sshll.u32 %s357_s24, 5  ;;  %363 = vst [vmem:[#allocation2 + $0x10] sm:$0xff] %v1610_v55  ;;  %364 = vst [vmem:[#allocation2 + $0x18] sm:$0xff] %v1610_v55  ;;  %s1613_s25 = smov 15  }
  0x56   : > { %s360_s29 = scalar_lea.vmem %s2028_s0, %s1321_s26  ;;  %365 = vst [vmem:[#allocation2 + $0x20] sm:$0xff] %v1610_v55  ;;  %366 = vst [vmem:[#allocation2 + $0x28] sm:$0xff] %v1610_v55  ;;  %s1614_s11 = smov 113  }
  0x57   : > { %v1794_v0 = vld [vmem:[%s360_s29] sm:$0xff]  ;;  %v1796_v1 = vld [vmem:[%s360_s29 + $0x8] sm:$0xff]  ;;  %v1798_v2 = vld [vmem:[%s360_s29 + $0x10] sm:$0xff]  ;;  %367 = vst [vmem:[#allocation2 + $0x30] sm:$0xff] %v1610_v55  ;;  %s1615_s15 = smov 112   ;;  %s1616_s18 = smov 111  }
  0x58   : > { %v402_v3 = vmul.f32 %v1794_v0, %v1794_v0  ;;  %v403_v4 = vmul.f32 %v1796_v1, %v1796_v1  ;;  %v396_v5 = vadd.f32 %v1796_v1, %v1794_v0  ;;  %v1806_v6 = vld [vmem:[%s360_s29 + $0x18] sm:$0xff]  ;;  %v404_v7 = vmul.f32 %v1798_v2, %v1798_v2  ;;  %368 = vst [vmem:[#allocation2 + $0x38] sm:$0xff] %v1610_v55  ;;  %s353_s16 = sand.u32 1, %s1590_s10   ;;  %p2056_p1 = scmp.ne.s32.totalorder %s2047_s19, 0 }
  0x59   : > { %v405_v8 = vmul.f32 %v1806_v6, %v1806_v6  ;;  %v399_v10 = vadd.f32 %v1806_v6, %v1798_v2  ;;  %369 = vst [vmem:[#allocation2 + $0x40] sm:$0xff] %v1610_v55  ;;  %370 = vst [vmem:[#allocation2 + $0x48] sm:$0xff] %v1610_v55  ;;  %s1986_s24 = scalar_lea.sflag [#allocation5], %s353_s16 }
  0x5a   : > { %v406_v9 = vadd.f32 %v403_v4, %v402_v3  ;;  %397 = vadd.xlane.f32.xlu0 %v396_v5  ;;  %371 = vst [vmem:[#allocation2 + $0x50] sm:$0xff] %v1610_v55  ;;  %372 = vst [vmem:[#allocation2 + $0x58] sm:$0xff] %v1610_v55 }
  0x5b   : > { %v409_v11 = vadd.f32 %v405_v8, %v404_v7  ;;  %373 = vst [vmem:[#allocation2 + $0x60] sm:$0xff] %v1610_v55  ;;  %374 = vst [vmem:[#allocation2 + $0x68] sm:$0xff] %v1610_v55 }
  0x5c   : > { %407 = vadd.xlane.f32.xlu1 %v406_v9  ;;  %375 = vst [vmem:[#allocation2 + $0x70] sm:$0xff] %v1610_v55  ;;  %376 = vst [vmem:[#allocation2 + $0x78] sm:$0xff] %v1610_v55 }
  0x5d   : > { %377 = vst [vmem:[#allocation2 + $0x80] sm:$0xff] %v1610_v55  ;;  %378 = vst [vmem:[#allocation2 + $0x88] sm:$0xff] %v1610_v55 }
  0x5e   : > { %400 = vadd.xlane.f32.xlu0 %v399_v10  ;;  %379 = vst [vmem:[#allocation2 + $0x90] sm:$0xff] %v1610_v55  ;;  %380 = vst [vmem:[#allocation2 + $0x98] sm:$0xff] %v1610_v55 }
  0x5f   : > { %381 = vst [vmem:[#allocation2 + $0xa0] sm:$0xff] %v1610_v55  ;;  %382 = vst [vmem:[#allocation2 + $0xa8] sm:$0xff] %v1610_v55 }
  0x60   : > { %410 = vadd.xlane.f32.xlu1 %v409_v11 }
  0xe7   : > { %v398_v13 = vpop.xlane.xlu0 %397 }
  0xe9   : > { %v408_v14 = vpop.xlane.xlu1 %407 }
  0xea   : > { %v413_v17 = vsel %vm412_vm1, %v398_v13, %v408_v14 }
  0xeb   : > { %v401_v15 = vpop.xlane.xlu0 %400 }
  0xed   : > { %v411_v16 = vpop.xlane.xlu1 %410 }
  0xee   : > { %v414_v18 = vsel %vm412_vm1, %v401_v15, %v411_v16 }
  0xef   : > { %v1334_v19 = vpack.c.bf16 %v414_v18, %v413_v17 }
  0xf1   : > { %1335 = vmatprep.subr.bf16.mxu1 %v1334_v19 }
  0xf2   : > { %1337 = vmatpush3.bf16.msra.mxu1 %v1334_v19 }
  0xf5   : > { %1332 = vmatmul.mubr.msk.f32.vlgmr.msra.gmra.mrb[0].mxu1 %vm417_vm0, %v416_v20 }
  0xf6   : > { %703 = vmatprep.mubr.f32.mxu1 %v1610_v55 }
 0x1c8   : > { %v1333_v21 = vpop.f32.mrb[0].mxu1 }
 0x1c9   : > { %v500_v22 = vmul.f32 0.0009765625, %v1333_v21  ;;  %v490_v23 = vpop.f32.mrb[1].mxu1 }
 0x1ca   : > { %v499_v24 = vmul.f32 0.0009765625, %v490_v23 }
 0x1cb   : > { %v502_v25 = vmul.f32 %v500_v22, %v500_v22 }
 0x1cc   : > { %v501_v26 = vmul.f32 %v499_v24, %v499_v24 }
 0x1cd   : > { %507 = vrot.lane.b32.xlu1 %v502_v25, %s1606_s14 }
 0x1ce   : > { %505 = vrot.lane.b32.xlu0 %v501_v26, %s1606_s14 }
 0x1d1   : > { %523 = vrot.lane.b32.xlu1 %v519_v27, %s1606_s14 }
 0x1d5   : > { %525 = vrot.lane.b32.xlu1 %v520_v28, %s1606_s14 }
 0x23f   : > { %v508_v30 = vpop.permute.xlu1 %507 }
 0x240   : > { %v512_v31 = vsub.f32 %v500_v22, %v508_v30  ;;  %v506_v32 = vpop.permute.xlu0 %505 }
 0x241   : > { %v511_v33 = vsub.f32 %v499_v24, %v506_v32 }
 0x242   : > { %v514_v34 = vmax.f32 %v512_v31, 0.0 }
 0x243   : > { %v513_v35 = vmax.f32 %v511_v33, 0.0  ;;  %v524_v38 = vpop.permute.xlu1 %523 }
 0x244   : > { %v516_v36 = vadd.f32 1e-05, %v514_v34 }
 0x245   : > { %v515_v37 = vadd.f32 1e-05, %v513_v35 }
 0x246   : > { %1442 = vrsqrt.f32 %v516_v36 }
 0x247   : > { %1444 = vrsqrt.f32 %v515_v37  ;;  %v526_v39 = vpop.permute.xlu1 %525 }
 0x250   : > { %v1443_v40 = vpop.eup %1442 }
 0x251   : > { %v1445_v41 = vpop.eup %1444  ;;  %v530_v42 = vmul.f32 %v1443_v40, %v526_v39 }
 0x252   : > { %v529_v43 = vmul.f32 %v1445_v41, %v524_v38 }
 0x253   : > { %537 = vrot.lane.b32.xlu1 %v530_v42, %s1608_s23 }
 0x254   : > { %535 = vrot.lane.b32.xlu0 %v529_v43, %s1608_s23 }
 0x257   : > { %550 = vperm.xlu1 %1438, %v530_v42  }
 0x258   : > { %546 = vperm.xlu0 %1439, %v529_v43  }
 0x25b   : > { %1441 = vset.pattern.permute.xlu1 %v1609_v45 }
 0x25c   : > { %575 = vperm.xlu1 %1441, %v571_v44   ;;  %1440 = vset.pattern.permute.xlu0 %v1609_v45 }
 0x2c5   : > { %v538_v47 = vpop.permute.xlu1 %537 }
 0x2c6   : > { %v542_v48 = vmul.f32 %v538_v47, %v500_v22  ;;  %v536_v50 = vpop.permute.xlu0 %535 }
 0x2c7   : > { %v541_v51 = vmul.f32 %v536_v50, %v499_v24 }
 0x2c8   : > { %v544_v52 = vsub.f32 %v532_v46, %v542_v48 }
 0x2c9   : > { %v543_v53 = vsub.f32 %v531_v49, %v541_v51 }
 0x2ca   : > { %564 = vperm.xlu0 %1440, %v544_v52  }
 0x2cb   : > { %559 = vperm.xlu1 %1441, %v543_v53  }
 0x2cf   : > { %580 = vperm.xlu1 %1441, %v572_v54  }
 0x2d6   : > { %v551_v56 = vpop.permute.xlu1 %550 }
 0x2d7   : > { %v547_v58 = vpop.permute.xlu0 %546  ;;  %v555_v4 = vmul.f32 %v551_v56, %v1798_v2  ;;  %v556_v5 = vmul.f32 %v551_v56, %v1806_v6 }
 0x2d8   : > { %v553_v59 = vmul.f32 %v547_v58, %v1794_v0  ;;  %v554_v60 = vmul.f32 %v547_v58, %v1796_v1 }
 0x2db   : > { %v576_v57 = vpop.permute.xlu1 %575 }
 0x349   : > { %v565_v62 = vpop.permute.xlu0 %564 }
 0x34a   : > { %v560_v61 = vpop.permute.xlu1 %559  ;;  %v569_v9 = vadd.f32 %v565_v62, %v555_v4  ;;  %v570_v10 = vadd.f32 %v565_v62, %v556_v5  ;;  %v1030_v62 = vld [vmem:[%s2036_s8] sm:$0xff] }
 0x34b   : > { %v567_v63 = vadd.f32 %v560_v61, %v553_v59  ;;  %v568_v3 = vadd.f32 %v560_v61, %v554_v60  ;;  %v384_v61 = vld [vmem:[#allocation6 + $0x11] ss:$8 sm:$0x3]  ;;  %v719_v4 = vld [vmem:[#allocation6] ss:$8 sm:$0x3] }
 0x34d   : > { %v583_v7 = vmul.f32 %v576_v57, %v567_v63  ;;  %v584_v8 = vmul.f32 %v576_v57, %v568_v3  ;;  %v1031_v63 = vld [vmem:[%s2036_s8 + $0x8] sm:$0xff] }
 0x34e   : > { %v581_v11 = vpop.permute.xlu1 %580 }
 0x34f   : > { %v1307_v12 = vmul.f32 -1.442695, %v583_v7  ;;  %v1308_v13 = vmul.f32 -1.442695, %v584_v8  ;;  %v585_v14 = vmul.f32 %v581_v11, %v569_v9  ;;  %v586_v15 = vmul.f32 %v581_v11, %v570_v10 }
 0x350   : > { %vm587_vm2 = vcmp.gt.f32.partialorder %v583_v7, 0.0  ;;  %vm588_vm3 = vcmp.gt.f32.partialorder %v584_v8, 0.0  ;;  %v743_v9 = vld [vmem:[#allocation6 + $0x1] ss:$8 sm:$0x3] }
 0x351   : > { %1446 = vpow2.f32 %v1307_v12  ;;  %v1309_v16 = vmul.f32 -1.442695, %v585_v14  ;;  %v1310_v17 = vmul.f32 -1.442695, %v586_v15  ;;  %vm589_vm4 = vcmp.gt.f32.partialorder %v585_v14, 0.0 }
 0x352   : > { %1448 = vpow2.f32 %v1308_v13  ;;  %vm590_vm5 = vcmp.gt.f32.partialorder %v586_v15, 0.0 }
 0x353   : > { %1450 = vpow2.f32 %v1309_v16 }
 0x354   : > { %1452 = vpow2.f32 %v1310_v17 }
 0x35b   : > { %v1447_v18 = vpop.eup %1446 }
 0x35c   : > { %v1449_v19 = vpop.eup %1448  ;;  %v603_v20 = vadd.f32 1.0, %v1447_v18  ;;  %v767_v18 = vld [vmem:[#allocation6 + $0x2] ss:$8 sm:$0x3] }
 0x35d   : > { %v604_v21 = vadd.f32 1.0, %v1449_v19  ;;  %v1451_v22 = vpop.eup %1450 }
 0x35e   : > { %1454 = vrcp.f32 %v603_v20  ;;  %v1453_v23 = vpop.eup %1452  ;;  %v605_v24 = vadd.f32 1.0, %v1451_v22 }
 0x35f   : > { %1456 = vrcp.f32 %v604_v21  ;;  %v606_v25 = vadd.f32 1.0, %v1453_v23 }
 0x360   : > { %1458 = vrcp.f32 %v605_v24 }
 0x361   : > { %1460 = vrcp.f32 %v606_v25 }
 0x368   : > { %v1455_v26 = vpop.eup %1454 }
 0x369   : > { %v1457_v27 = vpop.eup %1456  ;;  %v615_v28 = vsel %vm587_vm2, 1.0, %v1455_v26  ;;  %v619_v29 = vsel %vm587_vm2, 0.0, %v1455_v26 }
 0x36a   : > { %v1459_v30 = vpop.eup %1458  ;;  %v616_v31 = vsel %vm588_vm3, 1.0, %v1457_v27  ;;  %v620_v32 = vsel %vm588_vm3, 0.0, %v1457_v27  ;;  %v623_v34 = vmul.f32 %v615_v28, %v1794_v0  ;;  %v627_v35 = vmul.f32 %v619_v29, %v1794_v0  ;;  %v791_v27 = vld [vmem:[#allocation6 + $0x3] ss:$8 sm:$0x3] }
 0x36b   : > { %v1461_v33 = vpop.eup %1460  ;;  %v617_v36 = vsel %vm589_vm4, 1.0, %v1459_v30  ;;  %v621_v37 = vsel %vm589_vm4, 0.0, %v1459_v30  ;;  %v624_v42 = vmul.f32 %v616_v31, %v1796_v1  ;;  %v628_v43 = vmul.f32 %v620_v32, %v1796_v1 }
 0x36c   : > { %v618_v38 = vsel %vm590_vm5, 1.0, %v1461_v33  ;;  %v622_v39 = vsel %vm590_vm5, 0.0, %v1461_v33  ;;  %v625_v40 = vmul.f32 %v617_v36, %v1798_v2  ;;  %v629_v41 = vmul.f32 %v621_v37, %v1798_v2  ;;  %v635_v2 = vld [vmem:[%s2034_s6] sm:$0xff] }
 0x36d   : > { %v626_v44 = vmul.f32 %v618_v38, %v1806_v6  ;;  %v630_v45 = vmul.f32 %v622_v39, %v1806_v6  ;;  %v385_v1 = vlaneseq  ;;  %v808_v6 = vld [vmem:[#allocation6 + $0x4] ss:$8 sm:$0x3]  ;;  %v832_v36 = vld [vmem:[#allocation6 + $0x5] ss:$8 sm:$0x3] }
 0x36e   : > { %v631_v46 = vadd.f32 %v629_v41, %v623_v34  ;;  %v633_v47 = vadd.f32 %v627_v35, %v625_v40 }
 0x36f   : > { %v632_v48 = vadd.f32 %v630_v45, %v624_v42  ;;  %v634_v0 = vadd.f32 %v628_v43, %v626_v44  ;;  %v722_v51 = vshrl.u32 %v385_v1, 7  ;;  %vm387_vm6 = vcmp.lt.s32.totalorder %v385_v1, 256  ;;  %v856_v45 = vld [vmem:[#allocation6 + $0x6] ss:$8 sm:$0x3] }
 0x370   : > { %v1340_v49 = vpack.c.bf16 %v633_v47, %v631_v46  ;;  %390 = vst.msk [vmem:[#allocation2 + $0xa0] ss:$8 sm:$0x3] %vm387_vm6, %v384_v61  ;;  %v1900_v3 = vand.u32 127, %v385_v1 }
 0x371   : > { %v1338_v50 = vpack.c.bf16 %v634_v0, %v632_v48  ;;  %v1881_v52 = vsub.s32 0, %v722_v51  ;;  %v1883_v53 = vsub.s32 1, %v722_v51 }
 0x372   : > { %vm716_vm8 = vcmp.lt.s32.totalorder %v1900_v3, 17  ;;  %vm739_vm9 = vcmp.lt.s32.totalorder %v1900_v3, 16  ;;  %vm763_vm10 = vcmp.lt.s32.totalorder %v1900_v3, 15  ;;  %vm787_vm11 = vcmp.lt.s32.totalorder %v1900_v3, 1 }
 0x373   : > { %1339 = vmatprep.subr.bf16.mxu1 %v1338_v50  ;;  %v813_v54 = vrot.slane %v808_v6, %v1881_v52  ;;  %v817_v56 = vrot.slane %v808_v6, %v1883_v53  ;;  %v724_v5 = vrot.slane %v719_v4, %v1881_v52  ;;  %v728_v7 = vrot.slane %v719_v4, %v1883_v53 }
 0x374   : > { %1341 = vmatpush1.bf16.msra.mxu1 %v1340_v49  ;;  %v748_v15 = vrot.slane %v743_v9, %v1881_v52  ;;  %v752_v16 = vrot.slane %v743_v9, %v1883_v53  ;;  %v772_v24 = vrot.slane %v767_v18, %v1881_v52  ;;  %v776_v25 = vrot.slane %v767_v18, %v1883_v53  ;;  %v904_v9 = vld [vmem:[#allocation6 + $0x10] ss:$8 sm:$0x3] }
 0x375   : > { %v796_v33 = vrot.slane %v791_v27, %v1881_v52  ;;  %v800_v34 = vrot.slane %v791_v27, %v1883_v53  ;;  %vm828_vm12 = vcmp.lt.s32.totalorder %v1900_v3, 127  ;;  %v837_v42 = vrot.slane %v832_v36, %v1881_v52 }
 0x376   : > { %v841_v43 = vrot.slane %v832_v36, %v1883_v53  ;;  %vm852_vm13 = vcmp.lt.s32.totalorder %v1900_v3, 113  ;;  %vm876_vm14 = vcmp.lt.s32.totalorder %v1900_v3, 112  ;;  %vm900_vm15 = vcmp.lt.s32.totalorder %v1900_v3, 111 }
 0x377   : > { %1311 = vmatmul.mubr.msk.f32.vlgmr.msra.gmra.mrb[2].mxu1 %vm417_vm0, %v635_v2  ;;  %vm946_vm0 = vcmask 719872  }
 0x378   : > { %1103 = vmatprep.mubr.f32.mxu1 %v1610_v55 }
 0x44a   : > { %v705_v57 = vpop.f32.mrb[2].mxu1 }
 0x44b   : > { %v820_v58 = vmul.f32 %v813_v54, %v705_v57  ;;  %920 = vst [vmem:[#allocation2 + $0x90] sm:$0xf] %v705_v57  ;;  %710 = vrot.lane.b32.xlu0 %v705_v57, %s1611_s17  ;;  %v707_v59 = vpop.f32.mrb[3].mxu1 }
 0x44c   : > { %v821_v60 = vmul.f32 %v817_v56, %v707_v59  ;;  %921 = vst [vmem:[#allocation2 + $0x98] sm:$0xf] %v707_v59  ;;  %712 = vrot.lane.b32.xlu1 %v707_v59, %s1611_s17  ;;  %1039 = vmatprep.subr.mxu1 %v707_v59  ;;  %v861_v56 = vrot.slane %v856_v45, %v1881_v52  ;;  %s1302_s17 = sshll.u32 %s353_s16, 5 }
 0x44d   : > { %822 = vst [vmem:[#allocation2 + $0x40] sm:$0xf] %v820_v58  ;;  %1040 = vmatpush1.msra.mxu1 %v705_v57 }
 0x44e   : > { %823 = vst [vmem:[#allocation2 + $0x48] sm:$0xf] %v821_v60  ;;  %1314 = vmatmul.mubr.msk.f32.vlgmr.msra.gmra.mrb[4].mxu1 %vm1032_vm7, %v1030_v62 }
 0x44f   : > { %735 = vrot.lane.b32.xlu0 %v705_v57, %s1612_s22  ;;  %1109 = vmatprep.mubr.f32.mxu1 %v1610_v55 }
 0x450   : > { %737 = vrot.lane.b32.xlu1 %v707_v59, %s1612_s22 }
 0x452   : > { %1315 = vmatmul.mubr.msk.f32.gmra.mrb[6].mxu1 %vm1032_vm7, %v1031_v63 }
 0x453   : > { %759 = vrot.lane.b32.xlu0 %v705_v57, %s1613_s25 }
 0x454   : > { %761 = vrot.lane.b32.xlu1 %v707_v59, %s1613_s25  ;;  %s1322_s25 = sshll.u32 %s1690_s13, 9 }
 0x455   : > { %s1982_s27 = scalar_lea.hbm %s2037_s9, %s1322_s25 }
 0x457   : > { %783 = vrot.lane.b32.xlu0 %v705_v57, %s1606_s14 }
 0x458   : > { %785 = vrot.lane.b32.xlu1 %v707_v59, %s1606_s14 }
 0x45b   : > { %824 = vrot.lane.b32.xlu0 %v705_v57, %s1608_s23 }
 0x45c   : > { %826 = vrot.lane.b32.xlu1 %v707_v59, %s1608_s23  ;;  %s1617_s23 = smov [#allocation8]  }
 0x45d   : > { %s1532_s26 = sshll.u32 %s1617_s23, 4  ;;  %s1533_s26 = int_to_ptr.vmem [resolvable:$false] %s1532_s26 }
 0x45e   : > { %s1534_s28 = scalar_lea.vmem %s1533_s26, 1024 }
 0x45f   : > { %848 = vrot.lane.b32.xlu0 %v705_v57, %s1614_s11 }
 0x460   : > { %850 = vrot.lane.b32.xlu1 %v707_v59, %s1614_s11  ;;  %s355_s11 = scalar_lea.vmem [#allocation8], %s1302_s17 }
 0x463   : > { %872 = vrot.lane.b32.xlu0 %v705_v57, %s1615_s15 }
 0x464   : > { %874 = vrot.lane.b32.xlu1 %v707_v59, %s1615_s15  ;;  %s1210_s15 = sshll.u32 %s355_s11, 4  ;;  %s1984_s15 = int_to_ptr.vmem [resolvable:$true] %s1210_s15 }
 0x465   : > { %s1528_s14 = scalar_lea.vmem %s1984_s15, 512  ;;  %p1535_p4 = scmp.lt.s32.totalorder %s1984_s15, %s1533_s26 }
 0x466   : > { %p1529_p12 = scmp.ne.s32.totalorder %s1984_s15, %s1528_s14  ;;  %p1536_p7 = scmp.lt.s32.totalorder %s1534_s28, %s1528_s14 }
 0x467   : > { %896 = vrot.lane.b32.xlu0 %v705_v57, %s1616_s18  ;;  %v865_v57 = vrot.slane %v856_v45, %v1883_v53  ;;  %v944_v45 = vld [vmem:[#allocation2 + $0xa0] sm:$0xff] }
 0x468   : > { %898 = vrot.lane.b32.xlu1 %v707_v59, %s1616_s18  ;;  %v880_v59 = vld [vmem:[#allocation6 + $0x7] ss:$8 sm:$0x3]  ;;  %p1530_p2 = pnand %p1529_p12, %p2056_p1  ;;  %p1537_p8 = por %p1536_p7, %p1535_p4 }
 0x46a   : > { %p1531_p3 = pneg %p1530_p2 }
 0x46c   : > { %p1538_p11 = pnand %p1537_p8, %p1531_p3 }
 0x4bd   : > { %v711_v8 = vpop.permute.xlu0 %710 }
 0x4be   : > { %v713_v10 = vpop.permute.xlu1 %712 }
 0x4bf   : > { %v717_v11 = vsel %vm716_vm8, %v711_v8, %v713_v10  ;;  %v718_v12 = vsel %vm716_vm8, %v713_v10, %v711_v8 }
 0x4c0   : > { %v731_v13 = vmul.f32 %v724_v5, %v718_v12  ;;  %v732_v14 = vmul.f32 %v728_v7, %v717_v11  ;;  %v885_v5 = vrot.slane %v880_v59, %v1881_v52  ;;  %v889_v7 = vrot.slane %v880_v59, %v1883_v53 }
 0x4c1   : > { %v736_v17 = vpop.permute.xlu0 %735 }
 0x4c2   : > { %733 = vst [vmem:[#allocation2] sm:$0xf] %v731_v13  ;;  %734 = vst [vmem:[#allocation2 + $0x8] sm:$0xf] %v732_v14  ;;  %v738_v19 = vpop.permute.xlu1 %737 }
 0x4c3   : > { %v740_v20 = vsel %vm739_vm9, %v736_v17, %v738_v19  ;;  %v741_v21 = vsel %vm739_vm9, %v738_v19, %v736_v17 }
 0x4c4   : > { %v755_v22 = vmul.f32 %v748_v15, %v741_v21  ;;  %v756_v23 = vmul.f32 %v752_v16, %v740_v20  ;;  %v909_v21 = vrot.slane %v904_v9, %v1881_v52 }
 0x4c5   : > { %v760_v26 = vpop.permute.xlu0 %759 }
 0x4c6   : > { %757 = vst [vmem:[#allocation2 + $0x10] sm:$0xf] %v755_v22  ;;  %758 = vst [vmem:[#allocation2 + $0x18] sm:$0xf] %v756_v23  ;;  %v762_v28 = vpop.permute.xlu1 %761  ;;  %v913_v22 = vrot.slane %v904_v9, %v1883_v53  ;;  %v932_v23 = vld [vmem:[#allocation2 + $0x40] sm:$0xff] }
 0x4c7   : > { %v764_v29 = vsel %vm763_vm10, %v760_v26, %v762_v28  ;;  %v765_v30 = vsel %vm763_vm10, %v762_v28, %v760_v26 }
 0x4c8   : > { %v779_v31 = vmul.f32 %v772_v24, %v765_v30  ;;  %v780_v32 = vmul.f32 %v776_v25, %v764_v29  ;;  %v933_v25 = vld [vmem:[#allocation2 + $0x48] sm:$0xff] }
 0x4c9   : > { %v784_v35 = vpop.permute.xlu0 %783  ;;  %v925_v44 = vld [vmem:[#allocation2 + $0x8] sm:$0xff]  ;;  %v924_v48 = vld [vmem:[#allocation2] sm:$0xff] }
 0x4ca   : > { %781 = vst [vmem:[#allocation2 + $0x20] sm:$0xf] %v779_v31  ;;  %782 = vst [vmem:[#allocation2 + $0x28] sm:$0xf] %v780_v32  ;;  %v786_v37 = vpop.permute.xlu1 %785 }
 0x4cb   : > { %v788_v38 = vsel %vm787_vm11, %v784_v35, %v786_v37  ;;  %v789_v39 = vsel %vm787_vm11, %v786_v37, %v784_v35 }
 0x4cc   : > { %v803_v40 = vmul.f32 %v796_v33, %v789_v39  ;;  %v804_v41 = vmul.f32 %v800_v34, %v788_v38  ;;  %v942_v39 = vld [vmem:[#allocation2 + $0x90] sm:$0xff] }
 0x4cd   : > { %v825_v46 = vpop.permute.xlu0 %824  ;;  %v927_v47 = vld [vmem:[#allocation2 + $0x18] sm:$0xff]  ;;  %v926_v0 = vld [vmem:[#allocation2 + $0x10] sm:$0xff] }
 0x4ce   : > { %805 = vst [vmem:[#allocation2 + $0x30] sm:$0xf] %v803_v40  ;;  %806 = vst [vmem:[#allocation2 + $0x38] sm:$0xf] %v804_v41  ;;  %v827_v49 = vpop.permute.xlu1 %826  ;;  %v1342_v50 = vpack.c.bf16 %v927_v47, %v925_v44  ;;  %v1344_v2 = vpack.c.bf16 %v926_v0, %v924_v48  ;;  %v943_v41 = vld [vmem:[#allocation2 + $0x98] sm:$0xff]  ;;  %v945_v44 = vld [vmem:[#allocation2 + $0xa8] sm:$0xff] }
 0x4cf   : > { %v829_v1 = vsel %vm828_vm12, %v825_v46, %v827_v49  ;;  %v830_v51 = vsel %vm828_vm12, %v827_v49, %v825_v46  ;;  %v922_v46 = vld [vmem:[%s2035_s7] sm:$0xff]  ;;  %v923_v47 = vld [vmem:[%s2035_s7 + $0x8] sm:$0xff] }
 0x4d0   : > { %v844_v6 = vmul.f32 %v837_v42, %v829_v1  ;;  %v845_v54 = vmul.f32 %v841_v43, %v830_v51  ;;  %1343 = vmatprep.subr.bf16.mxu0 %v1342_v50 }
 0x4d1   : > { %v849_v58 = vpop.permute.xlu0 %848  ;;  %1345 = vmatpush1.bf16.msra.mxu0 %v1344_v2  ;;  %v929_v8 = vld [vmem:[#allocation2 + $0x28] sm:$0xff]  ;;  %v928_v12 = vld [vmem:[#allocation2 + $0x20] sm:$0xff] }
 0x4d2   : > { %846 = vst [vmem:[#allocation2 + $0x50] sm:$0xf] %v844_v6  ;;  %847 = vst [vmem:[#allocation2 + $0x58] sm:$0xf] %v845_v54  ;;  %v851_v60 = vpop.permute.xlu1 %850 }
 0x4d3   : > { %v853_v61 = vsel %vm852_vm13, %v849_v58, %v851_v60  ;;  %v854_v62 = vsel %vm852_vm13, %v851_v60, %v849_v58 }
 0x4d4   : > { %v868_v63 = vmul.f32 %v861_v56, %v853_v61  ;;  %v869_v4 = vmul.f32 %v865_v57, %v854_v62 }
 0x4d5   : > { %v873_v10 = vpop.permute.xlu0 %872  ;;  %v931_v11 = vld [vmem:[#allocation2 + $0x38] sm:$0xff]  ;;  %v930_v13 = vld [vmem:[#allocation2 + $0x30] sm:$0xff] }
 0x4d6   : > { %870 = vst [vmem:[#allocation2 + $0x60] sm:$0xf] %v868_v63  ;;  %871 = vst [vmem:[#allocation2 + $0x68] sm:$0xf] %v869_v4  ;;  %v875_v14 = vpop.permute.xlu1 %874  ;;  %v1346_v15 = vpack.c.bf16 %v931_v11, %v929_v8  ;;  %v1348_v16 = vpack.c.bf16 %v930_v13, %v928_v12 }
 0x4d7   : > { %v877_v17 = vsel %vm876_vm14, %v873_v10, %v875_v14  ;;  %v878_v18 = vsel %vm876_vm14, %v875_v14, %v873_v10 }
 0x4d8   : > { %v892_v19 = vmul.f32 %v885_v5, %v877_v17  ;;  %v893_v20 = vmul.f32 %v889_v7, %v878_v18  ;;  %1347 = vmatprep.subr.bf16.mxu0 %v1346_v15 }
 0x4d9   : > { %v897_v24 = vpop.permute.xlu0 %896  ;;  %1349 = vmatpush1.bf16.msra.mxu0 %v1348_v16  ;;  %v935_v26 = vld [vmem:[#allocation2 + $0x58] sm:$0xff]  ;;  %v934_v27 = vld [vmem:[#allocation2 + $0x50] sm:$0xff] }
 0x4da   : > { %894 = vst [vmem:[#allocation2 + $0x70] sm:$0xf] %v892_v19  ;;  %895 = vst [vmem:[#allocation2 + $0x78] sm:$0xf] %v893_v20  ;;  %v899_v28 = vpop.permute.xlu1 %898  ;;  %v1350_v29 = vpack.c.bf16 %v935_v26, %v933_v25  ;;  %v1352_v30 = vpack.c.bf16 %v934_v27, %v932_v23 }
 0x4db   : > { %v901_v31 = vsel %vm900_vm15, %v897_v24, %v899_v28  ;;  %v902_v32 = vsel %vm900_vm15, %v899_v28, %v897_v24 }
 0x4dc   : > { %v916_v52 = vmul.f32 %v909_v21, %v901_v31  ;;  %v917_v33 = vmul.f32 %v913_v22, %v902_v32  ;;  %1351 = vmatprep.subr.bf16.mxu0 %v1350_v29 }
 0x4dd   : > { %1353 = vmatpush1.bf16.msra.mxu0 %v1352_v30  ;;  %v937_v53 = vld [vmem:[#allocation2 + $0x68] sm:$0xff]  ;;  %v936_v35 = vld [vmem:[#allocation2 + $0x60] sm:$0xff] }
 0x4de   : > { %918 = vst [vmem:[#allocation2 + $0x80] sm:$0xf] %v916_v52  ;;  %919 = vst [vmem:[#allocation2 + $0x88] sm:$0xf] %v917_v33 }
 0x4e1   : > { %v939_v34 = vld [vmem:[#allocation2 + $0x78] sm:$0xff]  ;;  %v938_v36 = vld [vmem:[#allocation2 + $0x70] sm:$0xff] }
 0x4e2   : > { %v1354_v37 = vpack.c.bf16 %v939_v34, %v937_v53  ;;  %v1356_v38 = vpack.c.bf16 %v938_v36, %v936_v35 }
 0x4e4   : > { %1355 = vmatprep.subr.bf16.mxu0 %v1354_v37 }
 0x4e5   : > { %1357 = vmatpush1.bf16.msra.mxu0 %v1356_v38  ;;  %v941_v40 = vld [vmem:[#allocation2 + $0x88] sm:$0xff]  ;;  %v940_v42 = vld [vmem:[#allocation2 + $0x80] sm:$0xff] }
 0x4e6   : > { %v1358_v3 = vpack.c.bf16 %v943_v41, %v941_v40  ;;  %v1360_v43 = vpack.c.bf16 %v942_v39, %v940_v42 }
 0x4e8   : > { %1359 = vmatprep.subr.bf16.mxu0 %v1358_v3 }
 0x4e9   : > { %1361 = vmatpush1.bf16.msra.mxu0 %v1360_v43 }
 0x4ea   : > { %973 = vmatprep.subr.mxu0 %v945_v44 }
 0x4ed   : > { %974 = vmatpush1.msra.mxu0 %v944_v45 }
 0x4ee   : > { %1312 = vmatmul.mubr.msk.f32.vlgmr.msra.gmra.mrb[0].mxu0 %vm946_vm0, %v922_v46 }
 0x4ef   : > { %1023 = vmatprep.mubr.f32.mxu0 %v1610_v55 }
 0x4f2   : > { %1313 = vmatmul.mubr.msk.f32.gmra.mrb[2].mxu0 %vm946_vm0, %v923_v47 }
 0x521   : > { %v1945_v48 = vpop.f32.mrb[4].mxu1 }
 0x522   : > { %v1947_v0 = vpop.f32.mrb[5].mxu1 }
 0x523   : > { %v1124_v49 = vadd.f32 %v1947_v0, %v1945_v48 }
 0x525   : > { %v1951_v50 = vpop.f32.mrb[6].mxu1 }
 0x526   : > { %v1953_v2 = vpop.f32.mrb[7].mxu1 }
 0x527   : > { %v1127_v1 = vadd.f32 %v1953_v2, %v1951_v50 }
 0x5c1   : > { %v1957_v55 = vpop.f32.mrb[0].mxu0 }
 0x5c2   : > { %v1959_v51 = vpop.f32.mrb[1].mxu0 }
 0x5c3   : > { %v1116_v6 = vadd.f32 %v1959_v51, %v1957_v55 }
 0x5c5   : > { %1117 = vadd.xlane.f32.xlu0 %v1116_v6  ;;  %v1963_v54 = vpop.f32.mrb[2].mxu0 }
 0x5c6   : > { %v1965_v56 = vpop.f32.mrb[3].mxu0 }
 0x5c7   : > { %v1119_v57 = vadd.f32 %v1965_v56, %v1963_v54 }
 0x5c9   : > { %1125 = vadd.xlane.f32.xlu0 %v1124_v49  ;;  %1120 = vadd.xlane.f32.xlu1 %v1119_v57 }
 0x5cd   : > { %1128 = vadd.xlane.f32.xlu0 %v1127_v1 }
 0x652   : > { %v1118_v58 = vpop.xlane.xlu0 %1117 }
 0x653   : > { %v1122_v61 = vmul.f32 0.00390625, %v1118_v58 }
 0x656   : > { %v1126_v59 = vpop.xlane.xlu0 %1125  ;;  %v1121_v60 = vpop.xlane.xlu1 %1120 }
 0x657   : > { %v1123_v62 = vmul.f32 0.00390625, %v1121_v60  ;;  %v1130_v5 = vmul.f32 0.00390625, %v1126_v59 }
 0x659   : > { %v1132_v63 = vmax.f32 %v1122_v61, %v1123_v62 }
 0x65a   : > { %v1129_v4 = vpop.xlane.xlu0 %1128 }
 0x65b   : > { %v1133_v7 = vrot.slane %v1132_v63, 4  ;;  %v1131_v8 = vmul.f32 0.00390625, %v1129_v4 }
 0x65d   : > { %v1134_v9 = vmax.f32 %v1132_v63, %v1133_v7  ;;  %v1139_v10 = vmax.f32 %v1130_v5, %v1131_v8 }
 0x65f   : > { %v1135_v11 = vrot.slane %v1134_v9, 2  ;;  %v1140_v12 = vrot.slane %v1139_v10, 4 }
 0x661   : > { %v1136_v13 = vmax.f32 %v1134_v9, %v1135_v11  ;;  %v1141_v14 = vmax.f32 %v1139_v10, %v1140_v12 }
 0x663   : > { %v1142_v15 = vrot.slane %v1141_v14, 2  ;;  %v1137_v16 = vrot.slane %v1136_v13, 1 }
 0x665   : > { %v1143_v17 = vmax.f32 %v1141_v14, %v1142_v15  ;;  %v1138_v19 = vmax.f32 %v1136_v13, %v1137_v16 }
 0x667   : > { %v1144_v18 = vrot.slane %v1143_v17, 1 }
 0x669   : > { %v1145_v20 = vmax.f32 %v1143_v17, %v1144_v18 }
 0x66b   : > { %v1146_v21 = vmax.f32 %v1138_v19, %v1145_v20 }
 0x66d   : > { %v1147_v22 = vsub.f32 %v1122_v61, %v1146_v21  ;;  %v1148_v23 = vsub.f32 %v1123_v62, %v1146_v21  ;;  %v1153_v24 = vsub.f32 %v1130_v5, %v1146_v21  ;;  %v1154_v25 = vsub.f32 %v1131_v8, %v1146_v21 }
 0x66f   : > { %v1149_v26 = vmul.f32 1.442695, %v1147_v22  ;;  %v1151_v27 = vmul.f32 1.442695, %v1148_v23  ;;  %v1155_v28 = vmul.f32 1.442695, %v1153_v24 }
 0x670   : > { %v1157_v29 = vmul.f32 1.442695, %v1154_v25 }
 0x671   : > { %1462 = vpow2.f32 %v1149_v26 }
 0x672   : > { %1464 = vpow2.f32 %v1151_v27 }
 0x673   : > { %1466 = vpow2.f32 %v1155_v28 }
 0x674   : > { %1468 = vpow2.f32 %v1157_v29 }
 0x67b   : > { %v1463_v30 = vpop.eup %1462 }
 0x67c   : > { %v1465_v31 = vpop.eup %1464 }
 0x67d   : > { %v1467_v32 = vpop.eup %1466  ;;  %v1159_v52 = vadd.f32 %v1465_v31, %v1463_v30 }
 0x67e   : > { %v1469_v33 = vpop.eup %1468 }
 0x67f   : > { %v1160_v53 = vrot.slane %v1159_v52, 4  ;;  %v1166_v34 = vadd.f32 %v1469_v33, %v1467_v32 }
 0x681   : > { %v1161_v35 = vadd.f32 %v1160_v53, %v1159_v52  ;;  %v1167_v36 = vrot.slane %v1166_v34, 4 }
 0x683   : > { %v1162_v37 = vrot.slane %v1161_v35, 2  ;;  %v1168_v38 = vadd.f32 %v1167_v36, %v1166_v34 }
 0x685   : > { %v1163_v39 = vadd.f32 %v1162_v37, %v1161_v35  ;;  %v1169_v40 = vrot.slane %v1168_v38, 2 }
 0x687   : > { %v1164_v41 = vrot.slane %v1163_v39, 1  ;;  %v1170_v42 = vadd.f32 %v1169_v40, %v1168_v38 }
 0x689   : > { %v1165_v3 = vadd.f32 %v1164_v41, %v1163_v39  ;;  %v1171_v43 = vrot.slane %v1170_v42, 1 }
 0x68b   : > { %v1172_v44 = vadd.f32 %v1171_v43, %v1170_v42 }
 0x68d   : > { %v1173_v45 = vadd.f32 %v1172_v44, %v1165_v3 }
 0x68f   : > { %1470 = vrcp.f32 %v1173_v45 }
 0x699   : > { %v1471_v46 = vpop.eup %1470 }
 0x69a   : > { %v1176_v47 = vmul.f32 %v1471_v46, %v1463_v30  ;;  %v1177_v49 = vmul.f32 %v1471_v46, %v1465_v31  ;;  %v1178_v1 = vmul.f32 %v1471_v46, %v1467_v32  ;;  %v1179_v6 = vmul.f32 %v1471_v46, %v1469_v33 }
 0x69c   : > { %v1182_v57 = vmul.f32 %v1177_v49, %v1963_v54  ;;  %v1183_v58 = vmul.f32 %v1177_v49, %v1965_v56  ;;  %v1186_v59 = vmul.f32 %v1179_v6, %v1951_v50  ;;  %v1187_v60 = vmul.f32 %v1179_v6, %v1953_v2 }
 0x69d   : > { %v1180_v61 = vmul.f32 %v1176_v47, %v1957_v55  ;;  %v1181_v62 = vmul.f32 %v1176_v47, %v1959_v51  ;;  %v1184_v63 = vmul.f32 %v1178_v1, %v1945_v48  ;;  %v1185_v4 = vmul.f32 %v1178_v1, %v1947_v0 }
 0x69e   : > { %v1190_v5 = vadd.f32 %v1186_v59, %v1182_v57  ;;  %v1191_v7 = vadd.f32 %v1187_v60, %v1183_v58 }
 0x69f   : > { %v1188_v50 = vadd.f32 %v1184_v63, %v1180_v61  ;;  %v1189_v2 = vadd.f32 %v1185_v4, %v1181_v62 }
 0x6a0   : > { %1194 = vst [vmem:[%s355_s11 + $0x10] sm:$0xff] %v1190_v5  ;;  %1195 = vst [vmem:[%s355_s11 + $0x18] sm:$0xff] %v1191_v7 }
 0x6a1   : > { %1192 = vst [vmem:[%s355_s11] sm:$0xff] %v1188_v50  ;;  %1193 = vst [vmem:[%s355_s11 + $0x8] sm:$0xff] %v1189_v2 }
 0x6a2   : > { %1541 = shalt.err (!%p1538_p11)
}
 0x6a3   : > { %s1542_s21 = scalar_lea.hbm %s1982_s27, 512  ;;  %s1546_s17 = scalar_lea.hbm %s2037_s9, 1024 }
 0x6a4   : > { %p1543_p13 = scmp.ne.s32.totalorder %s1982_s27, %s1542_s21  ;;  %p1547_p6 = scmp.lt.u32.totalorder %s1982_s27, %s2037_s9 }
 0x6a5   : > { %p1548_p9 = scmp.lt.u32.totalorder %s1546_s17, %s1542_s21  ;;  %p1550_p12 = scmp.lt.u32.totalorder %s1542_s21, %s1982_s27 }
 0x6a6   : > { %p1544_p0 = pnand %p1543_p13, %p2056_p1 }
 0x6a7   : > { %p1549_p10 = por %p1548_p9, %p1547_p6 }
 0x6a8   : > { %p1545_p5 = pneg %p1544_p0 }
 0x6a9   : > { %p1551_p2 = por %p1550_p12, %p1549_p10 }
 0x6ab   : > { %p1552_p3 = pnand %p1551_p2, %p1545_p5 }
 0x6ad   : > { %1555 = shalt.err (!%p1552_p3)
}
 0x6ae   : > { %s1618_s13 = smov 256  }
 0x6af   : > { %1370 = dma.vmem_to_hbm [thread:$0]  (%p2056_p1), %s1984_s15, 512, %s1982_s27, %s1986_s24, %s1618_s13, %s1618_s13, %s1612_s22  }
 0x6b0 PF: > { %p1387_p4 = scmp.ge.s32.totalorder %s1598_s12, 2  ;;  %s1225_s18 = sand.u32 1, %s1586_s30  }
 0x6b1   : > { %p2057_p7 = scmp.ne.s32.totalorder %s2048_s20, 0  ;;  %s1226_s14 = scalar_lea.sflag [#allocation5], %s1225_s18 }
 0x6b3   : > { %p1380_p8 = pnand %p1387_p4, %p2057_p7 }
 0x6b5   : > { %1581 = dma.done.wait (!%p1380_p8), %s1226_s14, 512  }
 0x6b6   : > { %1583 = vsyncadd (!%p1380_p8), %s1226_s14, 4294966784  ;;  %s2058_s12 = sld [smem:[#allocation13_spill]]  ;;  %s2059_s23 = sld [smem:[#allocation12_spill]] }
 0x6b7   : > { %s2060_s11 = sld [smem:[#allocation14_spill]]  ;;  %s2061_s30 = smov %s1590_s10 }
 0x6bc   : > { %p21_p11 = scmp.ge.s32.totalorder %s2058_s12, 4   ;;  %s2062_s10 = smov %s2059_s23 }
 0x6be   :  { %23 = sbr.rel (!%p21_p11) target bundleno = 5 (0x5), region = 110 }
 0x6c5   :  { %1231 = vsyncpa [#allocation4], 1 }
 0x6c6   :  { %1233 = vsyncpa [#allocation4 + $0x1], 1 }
 0x6c7   :  { %1234 = vsyncpa [#allocation7], 1 }
 0x6c8   :  { %1235 = vsyncpa [#allocation5], 1 }
 0x6c9   :  { %1237 = vsyncpa [#allocation5 + $0x1], 1 }

</bundles_post_ra>
